<compile_context>
chip_gen: v5e
topology: v5e:2x2
jax: 0.10.0
libtpu: 0.0.40
codegen_flags: <defaults>
</compile_context>

<pallas_src>
import jax
import jax.numpy as jnp
from jax.experimental import pallas as pl
from jax.experimental.pallas import tpu as pltpu

HIDDEN = 512
OUT = 1024


def _round_up(n, m):
    return ((n + m - 1) // m) * m


def _vmem_capacity_bytes():
    try:
        return int(pltpu.get_tpu_info().vmem_capacity_bytes)
    except Exception:
        return 64 << 20  # conservative fallback: v7x per-TensorCore VMEM


def mlp_projector_kernel(x_ref, w1_ref, b1_ref, w2_ref, b2_ref, o_ref):
    # In-kernel cast on the VPU (free slack under an MXU/DMA-bound kernel);
    # avoids a separate wrapper-side XLA cast pass over x in HBM.
    x = x_ref[...].astype(w1_ref.dtype)
    # First linear: (TM, D_in) @ (D_in, 512), f32 accumulation on the MXU.
    h = jnp.dot(x, w1_ref[...], preferred_element_type=jnp.float32)
    # Bias + ReLU in f32 on the VPU.
    h = jnp.maximum(h + b1_ref[...], 0.0)
    # Second linear: (TM, 512) @ (512, 1024), f32 accumulation.
    y = jnp.dot(h.astype(w2_ref.dtype), w2_ref[...],
                preferred_element_type=jnp.float32)
    o_ref[...] = (y + b2_ref[...]).astype(o_ref.dtype)


def mlp_projector(x, w1, b1, w2, b2, *, tm=None, out_dtype=None):
    """x: (B, D_in); w1: (D_in, 512) bf16; b1: (1, 512) f32;
    w2: (512, 1024) bf16; b2: (1, 1024) f32. Returns (B, 1024) in out_dtype
    (defaults to x.dtype)."""
    B, D_in = x.shape
    assert w1.shape == (D_in, HIDDEN)
    assert b1.shape == (1, HIDDEN)
    assert w2.shape == (HIDDEN, OUT)
    assert b2.shape == (1, OUT)
    out_dtype = x.dtype if out_dtype is None else out_dtype

    x_isz = jnp.dtype(x.dtype).itemsize
    o_isz = jnp.dtype(out_dtype).itemsize
    w_isz = jnp.dtype(w1.dtype).itemsize

    # Weights/biases are VMEM-resident (constant index_map) -> counted ONCE.
    resident = (w1.size * w_isz + w2.size * jnp.dtype(w2.dtype).itemsize
                + b1.size * jnp.dtype(b1.dtype).itemsize
                + b2.size * jnp.dtype(b2.dtype).itemsize)

    def footprint(t):
        # Double-buffered streamed tiles + in-kernel intermediates.
        streamed = 2 * t * D_in * x_isz + 2 * t * OUT * o_isz
        interm = (t * D_in * w_isz          # bf16 copy of x tile
                  + t * HIDDEN * 4          # h (f32)
                  + t * HIDDEN * w_isz      # h cast to bf16
                  + t * OUT * 4)            # y (f32)
        return resident + streamed + interm

    usable = _vmem_capacity_bytes() - (8 << 20)  # ~56 MiB v7x, ~120 MiB v5e/v6e

    if tm is None:
        # Largest tile (up to 1024) that fits; small B rounds to the bf16
        # sublane-packing granule (16).
        tm_cap = min(_round_up(B, 16), 1024)
        cands = [tm_cap] + [c for c in (1024, 512, 256, 128, 64, 32, 16)
                            if c < tm_cap]
        tm = cands[-1]
        for c in cands:
            if footprint(c) <= usable:
                tm = c
                break
    else:
        assert tm % 16 == 0, "tm must be a multiple of the bf16 packing granule (16)"

    grid = (pl.cdiv(B, tm),)  # ragged tail handled by Pallas block masking

    # Right-size the VMEM request; never ask for more than the core has.
    vmem_limit = int(min(usable, max(32 << 20, footprint(tm) + (4 << 20))))

    return pl.pallas_call(
        mlp_projector_kernel,
        out_shape=jax.ShapeDtypeStruct((B, OUT), out_dtype),
        grid=grid,
        in_specs=[
            pl.BlockSpec((tm, D_in), lambda i: (i, 0)),      # x tile, pipelined
            pl.BlockSpec((D_in, HIDDEN), lambda i: (0, 0)),  # w1 resident
            pl.BlockSpec((1, HIDDEN), lambda i: (0, 0)),     # b1 resident
            pl.BlockSpec((HIDDEN, OUT), lambda i: (0, 0)),   # w2 resident
            pl.BlockSpec((1, OUT), lambda i: (0, 0)),        # b2 resident
        ],
        out_specs=pl.BlockSpec((tm, OUT), lambda i: (i, 0)),  # lane-dense N=1024
        compiler_params=pltpu.CompilerParams(
            dimension_semantics=("parallel",),  # megacore split on v7x
            vmem_limit_bytes=vmem_limit,
        ),
    )(x, w1, b1, w2, b2)


def init_params(key, d_in):
    """Deterministic init mirroring nn.Linear's uniform(-1/sqrt(fan_in), ...).
    Weights stored as (in, out) in bf16; biases in f32."""
    k1, k2, k3, k4 = jax.random.split(key, 4)
    bound1 = 1.0 / jnp.sqrt(d_in)
    bound2 = 1.0 / jnp.sqrt(HIDDEN)
    w1 = jax.random.uniform(k1, (d_in, HIDDEN), jnp.float32,
                            -bound1, bound1).astype(jnp.bfloat16)
    b1 = jax.random.uniform(k2, (1, HIDDEN), jnp.float32, -bound1, bound1)
    w2 = jax.random.uniform(k3, (HIDDEN, OUT), jnp.float32,
                            -bound2, bound2).astype(jnp.bfloat16)
    b2 = jax.random.uniform(k4, (1, OUT), jnp.float32, -bound2, bound2)
    return w1, b1, w2, b2


def _ref_mlp(x, w1, b1, w2, b2):
    xb = x.astype(w1.dtype)
    h = jnp.maximum(jnp.dot(xb, w1, preferred_element_type=jnp.float32) + b1, 0.0)
    return jnp.dot(h.astype(w2.dtype), w2, preferred_element_type=jnp.float32) + b2


if __name__ == "__main__":
    key = jax.random.PRNGKey(0)
    kx1, kx2, kp1, kp2 = jax.random.split(key, 4)

    # Test 1: tiny batch (single grid step, auto tile).
    B1, D1 = 8, 32  # LazyLinear infers D_in from the first call; here it's 32
    x1 = jax.random.normal(kx1, (B1, D1), jnp.float32)
    w1a, b1a, w2a, b2a = init_params(kp1, D1)
    y1 = jax.block_until_ready(mlp_projector(x1, w1a, b1a, w2a, b2a))
    y1_ref = _ref_mlp(x1, w1a, b1a, w2a, b2a)
    assert y1.shape == (B1, OUT)
    assert jnp.allclose(y1, y1_ref.astype(y1.dtype), atol=2e-2, rtol=2e-2)

    # Test 2: ragged batch with an explicit small tile -> multi-step pipelined
    # grid with a masked partial tail block (no jnp.pad in the wrapper).
    B2, D2 = 40, 128
    x2 = jax.random.normal(kx2, (B2, D2), jnp.float32)
    w1b, b1b, w2b, b2b = init_params(kp2, D2)
    y2 = jax.block_until_ready(mlp_projector(x2, w1b, b1b, w2b, b2b, tm=16))
    y2_ref = _ref_mlp(x2, w1b, b1b, w2b, b2b)
    assert y2.shape == (B2, OUT)
    assert jnp.allclose(y2, y2_ref.astype(y2.dtype), atol=2e-2, rtol=2e-2)

    print("KERNEL_OK")
</pallas_src>

<mosaic_0001>
module attributes {stable_mosaic.version = 11 : i64} {
  func.func @mlp_projector_kernel(%arg0: i32, %arg1: memref<16x32xf32, #tpu.memory_space<vmem>>, %arg2: memref<32x512xbf16, #tpu.memory_space<vmem>>, %arg3: memref<1x512xf32, #tpu.memory_space<vmem>>, %arg4: memref<512x1024xbf16, #tpu.memory_space<vmem>>, %arg5: memref<1x1024xf32, #tpu.memory_space<vmem>>, %arg6: memref<16x1024xf32, #tpu.memory_space<vmem>>) attributes {dimension_semantics = [#tpu.dimension_semantics<parallel>], iteration_bounds = array<i64: 1>, scalar_prefetch = 0 : i64, scratch_operands = 0 : i64, tpu.core_type = #tpu.core_type<tc>, window_params = [{transform_indices = @transform_0, window_bounds = array<i64: 16, 32>}, {pipeline_mode = #tpu.pipeline_mode<synchronous>, transform_indices = @transform_1, window_bounds = array<i64: 32, 512>}, {pipeline_mode = #tpu.pipeline_mode<synchronous>, transform_indices = @transform_2, window_bounds = array<i64: 1, 512>}, {pipeline_mode = #tpu.pipeline_mode<synchronous>, transform_indices = @transform_3, window_bounds = array<i64: 512, 1024>}, {pipeline_mode = #tpu.pipeline_mode<synchronous>, transform_indices = @transform_4, window_bounds = array<i64: 1, 1024>}, {transform_indices = @transform_5, window_bounds = array<i64: 16, 1024>}]} {
    %c0 = arith.constant 0 : index
    %c0_0 = arith.constant 0 : index
    %0 = vector.load %arg1[%c0, %c0_0] : memref<16x32xf32, #tpu.memory_space<vmem>>, vector<16x32xf32>
    %1 = arith.truncf %0 : vector<16x32xf32> to vector<16x32xbf16>
    %c0_1 = arith.constant 0 : index
    %c0_2 = arith.constant 0 : index
    %2 = vector.load %arg2[%c0_1, %c0_2] : memref<32x512xbf16, #tpu.memory_space<vmem>>, vector<32x512xbf16>
    %cst = arith.constant dense<0.000000e+00> : vector<16x512xf32>
    %3 = tpu.matmul %1, %2, %cst {dimension_numbers = #tpu.dot_dimension_numbers<[1], [0], [0], [1], [0, 0, 1, 1], [], []>} : vector<16x32xbf16>, vector<32x512xbf16>, vector<16x512xf32> -> vector<16x512xf32>
    %c0_3 = arith.constant 0 : index
    %c0_4 = arith.constant 0 : index
    %4 = vector.load %arg3[%c0_3, %c0_4] : memref<1x512xf32, #tpu.memory_space<vmem>>, vector<1x512xf32>
    %5 = vector.broadcast %4 : vector<1x512xf32> to vector<16x512xf32>
    %6 = arith.addf %3, %5 : vector<16x512xf32>
    %cst_5 = arith.constant 0.000000e+00 : f32
    %7 = vector.broadcast %cst_5 : f32 to vector<16x512xf32>
    %8 = arith.maximumf %6, %7 : vector<16x512xf32>
    %9 = arith.truncf %8 : vector<16x512xf32> to vector<16x512xbf16>
    %c0_6 = arith.constant 0 : index
    %c0_7 = arith.constant 0 : index
    %10 = vector.load %arg4[%c0_6, %c0_7] : memref<512x1024xbf16, #tpu.memory_space<vmem>>, vector<512x1024xbf16>
    %cst_8 = arith.constant dense<0.000000e+00> : vector<16x1024xf32>
    %11 = tpu.matmul %9, %10, %cst_8 {dimension_numbers = #tpu.dot_dimension_numbers<[1], [0], [0], [1], [0, 0, 1, 1], [], []>} : vector<16x512xbf16>, vector<512x1024xbf16>, vector<16x1024xf32> -> vector<16x1024xf32>
    %c0_9 = arith.constant 0 : index
    %c0_10 = arith.constant 0 : index
    %12 = vector.load %arg5[%c0_9, %c0_10] : memref<1x1024xf32, #tpu.memory_space<vmem>>, vector<1x1024xf32>
    %13 = vector.broadcast %12 : vector<1x1024xf32> to vector<16x1024xf32>
    %14 = arith.addf %11, %13 : vector<16x1024xf32>
    %c0_11 = arith.constant 0 : index
    %c0_12 = arith.constant 0 : index
    %15 = vector.load %arg6[%c0_11, %c0_12] : memref<16x1024xf32, #tpu.memory_space<vmem>>, vector<16x1024xf32>
    tpu.vector_store %arg6[%c0_11, %c0_12], %14 {strides = array<i32>} : memref<16x1024xf32, #tpu.memory_space<vmem>>, vector<16x1024xf32>,
    return
  }
  func.func @transform_0(%arg0: i32) -> (i32, i32) {
    %c0_i32 = arith.constant 0 : i32
    %c0_i32_0 = arith.constant 0 : i32
    return %arg0, %c0_i32 : i32, i32
  }
  func.func @transform_1(%arg0: i32) -> (i32, i32) {
    %c0_i32 = arith.constant 0 : i32
    %c0_i32_0 = arith.constant 0 : i32
    %c0_i32_1 = arith.constant 0 : i32
    return %c0_i32, %c0_i32_0 : i32, i32
  }
  func.func @transform_2(%arg0: i32) -> (i32, i32) {
    %c0_i32 = arith.constant 0 : i32
    %c0_i32_0 = arith.constant 0 : i32
    %c0_i32_1 = arith.constant 0 : i32
    return %c0_i32, %c0_i32_0 : i32, i32
  }
  func.func @transform_3(%arg0: i32) -> (i32, i32) {
    %c0_i32 = arith.constant 0 : i32
    %c0_i32_0 = arith.constant 0 : i32
    %c0_i32_1 = arith.constant 0 : i32
    return %c0_i32, %c0_i32_0 : i32, i32
  }
  func.func @transform_4(%arg0: i32) -> (i32, i32) {
    %c0_i32 = arith.constant 0 : i32
    %c0_i32_0 = arith.constant 0 : i32
    %c0_i32_1 = arith.constant 0 : i32
    return %c0_i32, %c0_i32_0 : i32, i32
  }
  func.func @transform_5(%arg0: i32) -> (i32, i32) {
    %c0_i32 = arith.constant 0 : i32
    %c0_i32_0 = arith.constant 0 : i32
    return %arg0, %c0_i32 : i32, i32
  }
}

</mosaic_0001>

<bundles_post_ra>
// kernel: tpu_custom_call.1
= control target key start
LH: loop header
LB: loop body
LE: loop exit
PB: predicated region body
PF: predicated region fallthrough
CT: control target
= control target key end

     0   :  { %10 = vsyncpa [#allocation3], 0  ;;  %s3878_s0 = inlined_call_operand.hbm [shape: f32[8,32], index: 0, kind: input, shape index: {}]   ;;  %s3879_s1 = inlined_call_operand.hbm [shape: bf16[32,512], index: 1, kind: input, shape index: {}]   ;;  %s3880_s2 = inlined_call_operand.hbm [shape: f32[1,512], index: 2, kind: input, shape index: {}]   ;;  %s3881_s3 = inlined_call_operand.hbm [shape: bf16[512,1024], index: 3, kind: input, shape index: {}]   ;;  %s3882_s4 = inlined_call_operand.hbm [shape: f32[1,1024], index: 4, kind: input, shape index: {}]   ;;  %s3883_s5 = inlined_call_operand.hbm [shape: f32[8,1024], index: 5, kind: output, shape index: {}]  }
   0x1   :  { %11 = vsyncpa [#allocation6], 0 }
   0x2   :  { %12 = vsyncpa [#allocation9], 0 }
   0x3   :  { %13 = vsyncpa [#allocation4], 0  ;;  %s31_s20 = sshll.u32 %s3879_s1, 4  ;;  %s32_s20 = int_to_ptr.hbm [resolvable:$true] %s31_s20 }
   0x4   :  { %17 = vsyncadd [#allocation3], 128  ;;  %s3758_s21 = smov [#allocation5]   ;;  %s55_s25 = sshll.u32 %s3881_s3, 4  ;;  %s56_s25 = int_to_ptr.hbm [resolvable:$true] %s55_s25 }
   0x5   :  { %s33_s22 = sshll.u32 %s3758_s21, 4  ;;  %s3759_s26 = smov 256   ;;  %s34_s22 = int_to_ptr.vmem [resolvable:$true] %s33_s22 }
   0x6   :  { %s3760_s27 = smov 16   ;;  %s3761_s28 = smov [#allocation8]  }
   0x7   :  { %39 = dma.hbm_to_vmem [thread:$0]  %s32_s20, 1024, %s34_s22, [#allocation6], %s3759_s26, %s3759_s26, %s3760_s27  }
   0x8   :  { %s57_s29 = sshll.u32 %s3761_s28, 4  ;;  %s3762_s30 = smov 512   ;;  %s58_s29 = int_to_ptr.vmem [resolvable:$true] %s57_s29 }
   0x9   :  { %s3763_s6 = smov 32   ;;  %s18_s8 = sshll.u32 %s3878_s0, 4  ;;  %s19_s8 = int_to_ptr.hbm [resolvable:$true] %s18_s8 }
   0xa   :  { %63 = dma.hbm_to_vmem [thread:$0]  %s56_s25, 32768, %s58_s29, [#allocation9], %s3762_s30, %s3762_s30, %s3763_s6  }
   0xb   :  { %s3764_s9 = smov [#allocation2]   ;;  %s45_s12 = sshll.u32 %s3880_s2, 4  ;;  %s46_s12 = int_to_ptr.hbm [resolvable:$true] %s45_s12 }
   0xc   :  { %s20_s10 = sshll.u32 %s3764_s9, 4  ;;  %s3765_s13 = smov 128   ;;  %s21_s10 = int_to_ptr.vmem [resolvable:$true] %s20_s10 }
   0xd   :  { %s3766_s14 = smov 8   ;;  %s3767_s15 = smov [#allocation7]  }
   0xe   :  { %26 = dma.hbm_to_vmem [thread:$0]  %s19_s8, 128, %s21_s10, [#allocation3], %s3765_s13, %s3765_s13, %s3766_s14  }
   0xf   :  { %s47_s16 = sshll.u32 %s3767_s15, 4  ;;  %s69_s19 = sshll.u32 %s3882_s4, 4  ;;  %s48_s16 = int_to_ptr.vmem [resolvable:$true] %s47_s16  ;;  %s70_s19 = int_to_ptr.hbm [resolvable:$true] %s69_s19 }
  0x10   :  { %50 = dma.hbm_to_vmem [thread:$0]  %s46_s12, 64, %s48_s16, [#allocation6]  }
  0x11   :  { %s3768_s0 = smov [#allocation10]  }
  0x12   :  { %s71_s20 = sshll.u32 %s3768_s0, 4  ;;  %s72_s20 = int_to_ptr.vmem [resolvable:$true] %s71_s20 }
  0x13   :  { %74 = dma.hbm_to_vmem [thread:$0]  %s70_s19, 128, %s72_s20, [#allocation9]  }
  0x14   :  { %3750 = dma.done.wait [#allocation3], 256  }
  0x15   :  { %3751 = vsyncadd [#allocation3], 4294967040 }
  0x16   :  { %3752 = dma.done.wait [#allocation6], 1088  }
  0x17   :  { %3753 = vsyncadd [#allocation6], 4294966208 }
  0x18   :  { %3754 = dma.done.wait [#allocation9], 32896  }
  0x19   :  { %3755 = vsyncadd [#allocation9], 4294934400  ;;  %v2286_v0 = vld [vmem:[#allocation5 + $0x20] sm:$0xf]  ;;  %v3334_v1 = vld [vmem:[#allocation5 + $0x2c] sm:$0xf0] }
  0x1a   :  { %v3332_v2 = vld [vmem:[#allocation5 + $0x24] sm:$0xf]  ;;  %v2287_v3 = vor.u32 %v3334_v1, %v2286_v0  ;;  %v2288_v4 = vld [vmem:[#allocation5 + $0x30] sm:$0xf0]  ;;  %v2294_v5 = vld [vmem:[#allocation5 + $0x28] sm:$0xf] }
  0x1b   :  { %v3335_v6 = vld [vmem:[#allocation5 + $0x34] sm:$0xf0]  ;;  %v2291_v7 = vor.u32 %v3332_v2, %v2288_v4  ;;  %v3333_v9 = vld [vmem:[#allocation5 + $0x2c] sm:$0xf]  ;;  %v2296_v10 = vld [vmem:[#allocation5 + $0x38] sm:$0xf0] }
  0x1c   :  { %v2295_v8 = vor.u32 %v3335_v6, %v2294_v5  ;;  %v2270_v11 = vld [vmem:[#allocation5] sm:$0xf]  ;;  %167 = vmatpush.bf16.msra.mxu0 %v2287_v3  ;;  %v2299_v12 = vor.u32 %v3333_v9, %v2296_v10  ;;  %v3330_v13 = vld [vmem:[#allocation5 + $0xc] sm:$0xf0]  ;;  %v3328_v14 = vld [vmem:[#allocation5 + $0x4] sm:$0xf] }
  0x1d   :  { %v2272_v15 = vld [vmem:[#allocation5 + $0x10] sm:$0xf0]  ;;  %181 = vmatpush.bf16.msra.mxu1 %v2291_v7  ;;  %v2271_v16 = vor.u32 %v3330_v13, %v2270_v11  ;;  %v2278_v18 = vld [vmem:[#allocation5 + $0x8] sm:$0xf]  ;;  %v3331_v19 = vld [vmem:[#allocation5 + $0x14] sm:$0xf0] }
  0x1e   :  { %195 = vmatpush.bf16.msra.mxu2 %v2295_v8  ;;  %v2275_v17 = vor.u32 %v3328_v14, %v2272_v15  ;;  %v3329_v20 = vld [vmem:[#allocation5 + $0xc] sm:$0xf]  ;;  %209 = vmatpush.bf16.msra.mxu3 %v2299_v12  ;;  %v2279_v21 = vor.u32 %v3331_v19, %v2278_v18  ;;  %v2280_v22 = vld [vmem:[#allocation5 + $0x18] sm:$0xf0]  ;;  %v96_v23 = vld [vmem:[#allocation2] sm:$0xff]  ;;  %vm157_vm0 = vcmask 261120  }
  0x1f   :  { %v97_v24 = vld [vmem:[#allocation2 + $0x8] sm:$0xff]  ;;  %v2283_v25 = vor.u32 %v3329_v20, %v2280_v22  ;;  %v2530_v27 = vld [vmem:[#allocation8 + $0x1c0] sm:$0xf] }
  0x20   :  { %v98_v26 = vpack.c.bf16 %v97_v24, %v96_v23  ;;  %v3396_v28 = vld [vmem:[#allocation8 + $0x1dc] sm:$0xf0]  ;;  %168 = vmatpush.bf16.msra.mxu0 %v2271_v16 }
  0x21   :  { %v2786_v29 = vld [vmem:[#allocation8 + $0x3c0] sm:$0xf]  ;;  %v2531_v30 = vor.u32 %v3396_v28, %v2530_v27  ;;  %182 = vmatpush.bf16.msra.mxu1 %v2275_v17 }
  0x22   :  { %v3460_v31 = vld [vmem:[#allocation8 + $0x3dc] sm:$0xf0]  ;;  %196 = vmatpush.bf16.msra.mxu2 %v2279_v21  ;;  %210 = vmatpush.bf16.msra.mxu3 %v2283_v25 }
  0x23   :  { %v2498_v32 = vld [vmem:[#allocation8 + $0x180] sm:$0xf]  ;;  %v2787_v34 = vor.u32 %v3460_v31, %v2786_v29  ;;  %2300 = vmatmul.msk.bf16.vlgmr.msra.gmra.mxu0 %vm157_vm0, %v98_v26 }
  0x24   :  { %v3388_v33 = vld [vmem:[#allocation8 + $0x19c] sm:$0xf0]  ;;  %1783 = vmatpush.bf16.msrb.mxu0 %v2531_v30  ;;  %2301 = vmatmul.msk.bf16.vlgmr.msra.gmra.mxu1 %vm157_vm0, %v98_v26 }
  0x25   :  { %v2754_v35 = vld [vmem:[#allocation8 + $0x380] sm:$0xf]  ;;  %v2499_v38 = vor.u32 %v3388_v33, %v2498_v32  ;;  %1797 = vmatpush.bf16.msrb.mxu1 %v2787_v34  ;;  %2302 = vmatmul.msk.bf16.vlgmr.msra.gmra.mxu2 %vm157_vm0, %v98_v26 }
  0x26   :  { %v3452_v36 = vld [vmem:[#allocation8 + $0x39c] sm:$0xf0]  ;;  %2303 = vmatmul.msk.bf16.vlgmr.msra.gmra.mxu3 %vm157_vm0, %v98_v26 }
  0x27   :  { %v3042_v37 = vld [vmem:[#allocation8 + $0x5c0] sm:$0xf]  ;;  %v2755_v42 = vor.u32 %v3452_v36, %v2754_v35 }
  0x28   :  { %v3524_v39 = vld [vmem:[#allocation8 + $0x5dc] sm:$0xf0]  ;;  %1784 = vmatpush.bf16.msrb.mxu0 %v2499_v38 }
  0x29   :  { %v3298_v40 = vld [vmem:[#allocation8 + $0x7c0] sm:$0xf]  ;;  %v3043_v43 = vor.u32 %v3524_v39, %v3042_v37  ;;  %1798 = vmatpush.bf16.msrb.mxu1 %v2755_v42 }
  0x2a   :  { %v3588_v41 = vld [vmem:[#allocation8 + $0x7dc] sm:$0xf0] }
  0x2b   :  { %v3299_v44 = vor.u32 %v3588_v41, %v3298_v40  ;;  %v2466_v45 = vld [vmem:[#allocation8 + $0x140] sm:$0xf]  ;;  %1811 = vmatpush.bf16.msrb.mxu2 %v3043_v43 }
  0x2c   :  { %v3380_v46 = vld [vmem:[#allocation8 + $0x15c] sm:$0xf0] }
  0x2d   :  { %v2722_v47 = vld [vmem:[#allocation8 + $0x340] sm:$0xf]  ;;  %1825 = vmatpush.bf16.msrb.mxu3 %v3299_v44  ;;  %v2467_v54 = vor.u32 %v3380_v46, %v2466_v45 }
  0x2e   :  { %v3444_v48 = vld [vmem:[#allocation8 + $0x35c] sm:$0xf0] }
  0x2f   :  { %v3010_v49 = vld [vmem:[#allocation8 + $0x580] sm:$0xf]  ;;  %v2723_v58 = vor.u32 %v3444_v48, %v2722_v47  ;;  %1785 = vmatpush.bf16.msrb.mxu0 %v2467_v54 }
  0x30   :  { %v3516_v50 = vld [vmem:[#allocation8 + $0x59c] sm:$0xf0] }
  0x31   :  { %v3011_v51 = vor.u32 %v3516_v50, %v3010_v49  ;;  %v3266_v52 = vld [vmem:[#allocation8 + $0x780] sm:$0xf]  ;;  %1799 = vmatpush.bf16.msrb.mxu1 %v2723_v58  ;;  %v3392_v49 = vld [vmem:[#allocation8 + $0x1c4] sm:$0xf] }
  0x32   :  { %v3580_v53 = vld [vmem:[#allocation8 + $0x79c] sm:$0xf0]  ;;  %v2532_v50 = vld [vmem:[#allocation8 + $0x1e0] sm:$0xf0] }
  0x33   :  { %v3267_v55 = vor.u32 %v3580_v53, %v3266_v52  ;;  %v2434_v56 = vld [vmem:[#allocation8 + $0x100] sm:$0xf]  ;;  %1812 = vmatpush.bf16.msrb.mxu2 %v3011_v51  ;;  %v3456_v51 = vld [vmem:[#allocation8 + $0x3c4] sm:$0xf] }
  0x34   :  { %v3372_v57 = vld [vmem:[#allocation8 + $0x11c] sm:$0xf0]  ;;  %v2788_v52 = vld [vmem:[#allocation8 + $0x3e0] sm:$0xf0] }
  0x35   :  { %v2978_v59 = vld [vmem:[#allocation8 + $0x540] sm:$0xf]  ;;  %1826 = vmatpush.bf16.msrb.mxu3 %v3267_v55  ;;  %v2435_v2 = vor.u32 %v3372_v57, %v2434_v56  ;;  %v3384_v56 = vld [vmem:[#allocation8 + $0x184] sm:$0xf] }
  0x36   :  { %v3508_v60 = vld [vmem:[#allocation8 + $0x55c] sm:$0xf0] }
  0x37   :  { %v3234_v61 = vld [vmem:[#allocation8 + $0x740] sm:$0xf]  ;;  %v2979_v1 = vor.u32 %v3508_v60, %v2978_v59  ;;  %1786 = vmatpush.bf16.msrb.mxu0 %v2435_v2  ;;  %v2500_v2 = vld [vmem:[#allocation8 + $0x1a0] sm:$0xf0] }
  0x38   :  { %v2690_v62 = vld [vmem:[#allocation8 + $0x300] sm:$0xf] }
  0x39   :  { %v3436_v63 = vld [vmem:[#allocation8 + $0x31c] sm:$0xf0]  ;;  %1813 = vmatpush.bf16.msrb.mxu2 %v2979_v1  ;;  %v2791_v1 = vor.u32 %v3456_v51, %v2788_v52  ;;  %v3416_v51 = vld [vmem:[#allocation8 + $0x284] sm:$0xf] }
  0x3a   :  { %v3572_v0 = vld [vmem:[#allocation8 + $0x75c] sm:$0xf0]  ;;  %v2691_v7 = vor.u32 %v3436_v63, %v2690_v62  ;;  %v3520_v63 = vld [vmem:[#allocation8 + $0x5c4] sm:$0xf] }
  0x3b   :  { %v3235_v3 = vor.u32 %v3572_v0, %v3234_v61  ;;  %v2402_v4 = vld [vmem:[#allocation8 + $0xc0] sm:$0xf]  ;;  %v2535_v61 = vor.u32 %v3392_v49, %v2532_v50  ;;  %v3044_v0 = vld [vmem:[#allocation8 + $0x5e0] sm:$0xf0] }
  0x3c   :  { %v2946_v5 = vld [vmem:[#allocation8 + $0x500] sm:$0xf]  ;;  %1800 = vmatpush.bf16.msrb.mxu1 %v2691_v7  ;;  %v3352_v49 = vld [vmem:[#allocation8 + $0x84] sm:$0xf] }
  0x3d   :  { %v3500_v6 = vld [vmem:[#allocation8 + $0x51c] sm:$0xf0]  ;;  %1827 = vmatpush.bf16.msrb.mxu3 %v3235_v3  ;;  %v3584_v3 = vld [vmem:[#allocation8 + $0x7c4] sm:$0xf] }
  0x3e   :  { %v3364_v8 = vld [vmem:[#allocation8 + $0xdc] sm:$0xf0]  ;;  %v2947_v13 = vor.u32 %v3500_v6, %v2946_v5  ;;  %v3448_v5 = vld [vmem:[#allocation8 + $0x384] sm:$0xf] }
  0x3f   :  { %v3202_v9 = vld [vmem:[#allocation8 + $0x700] sm:$0xf]  ;;  %v2403_v14 = vor.u32 %v3364_v8, %v2402_v4  ;;  %v3300_v4 = vld [vmem:[#allocation8 + $0x7e0] sm:$0xf0] }
  0x40   :  { %v3564_v10 = vld [vmem:[#allocation8 + $0x71c] sm:$0xf0]  ;;  %1814 = vmatpush.bf16.msrb.mxu2 %v2947_v13  ;;  %v2756_v6 = vld [vmem:[#allocation8 + $0x3a0] sm:$0xf0] }
  0x41   :  { %v2658_v11 = vld [vmem:[#allocation8 + $0x2c0] sm:$0xf]  ;;  %v3203_v15 = vor.u32 %v3564_v10, %v3202_v9  ;;  %1787 = vmatpush.bf16.msrb.mxu0 %v2403_v14  ;;  %v3047_v9 = vor.u32 %v3520_v63, %v3044_v0  ;;  %v2503_v10 = vor.u32 %v3384_v56, %v2500_v2  ;;  %v3512_v13 = vld [vmem:[#allocation8 + $0x584] sm:$0xf] }
  0x42   :  { %v3428_v12 = vld [vmem:[#allocation8 + $0x2dc] sm:$0xf0]  ;;  %v3012_v14 = vld [vmem:[#allocation8 + $0x5a0] sm:$0xf0] }
  0x43   :  { %v2370_v16 = vld [vmem:[#allocation8 + $0x80] sm:$0xf]  ;;  %v2659_v19 = vor.u32 %v3428_v12, %v2658_v11  ;;  %1828 = vmatpush.bf16.msrb.mxu3 %v3203_v15  ;;  %v3303_v11 = vor.u32 %v3584_v3, %v3300_v4  ;;  %v3376_v12 = vld [vmem:[#allocation8 + $0x144] sm:$0xf]  ;;  %v2759_v15 = vor.u32 %v3448_v5, %v2756_v6 }
  0x44   :  { %v2914_v17 = vld [vmem:[#allocation8 + $0x4c0] sm:$0xf]  ;;  %v2372_v50 = vld [vmem:[#allocation8 + $0xa0] sm:$0xf0] }
  0x45   :  { %v3492_v18 = vld [vmem:[#allocation8 + $0x4dc] sm:$0xf0]  ;;  %1801 = vmatpush.bf16.msrb.mxu1 %v2659_v19  ;;  %v3440_v19 = vld [vmem:[#allocation8 + $0x344] sm:$0xf]  ;;  %v2375_v52 = vor.u32 %v3352_v49, %v2372_v50 }
  0x46   :  { %v3356_v20 = vld [vmem:[#allocation8 + $0x9c] sm:$0xf0]  ;;  %v2915_v25 = vor.u32 %v3492_v18, %v2914_v17  ;;  %v3576_v17 = vld [vmem:[#allocation8 + $0x784] sm:$0xf] }
  0x47   :  { %v3170_v21 = vld [vmem:[#allocation8 + $0x6c0] sm:$0xf]  ;;  %v2371_v26 = vor.u32 %v3356_v20, %v2370_v16  ;;  %v2468_v16 = vld [vmem:[#allocation8 + $0x160] sm:$0xf0] }
  0x48   :  { %v3556_v22 = vld [vmem:[#allocation8 + $0x6dc] sm:$0xf0]  ;;  %1815 = vmatpush.bf16.msrb.mxu2 %v2915_v25  ;;  %v3268_v18 = vld [vmem:[#allocation8 + $0x7a0] sm:$0xf0] }
  0x49   :  { %v2626_v23 = vld [vmem:[#allocation8 + $0x280] sm:$0xf]  ;;  %v3171_v27 = vor.u32 %v3556_v22, %v3170_v21  ;;  %1788 = vmatpush.bf16.msrb.mxu0 %v2371_v26  ;;  %v2724_v20 = vld [vmem:[#allocation8 + $0x360] sm:$0xf0]  ;;  %v3015_v21 = vor.u32 %v3512_v13, %v3012_v14  ;;  %v2471_v22 = vor.u32 %v3376_v12, %v2468_v16 }
  0x4a   :  { %v3420_v24 = vld [vmem:[#allocation8 + $0x29c] sm:$0xf0]  ;;  %v3368_v25 = vld [vmem:[#allocation8 + $0x104] sm:$0xf] }
  0x4b   :  { %v2338_v28 = vld [vmem:[#allocation8 + $0x40] sm:$0xf]  ;;  %v2627_v31 = vor.u32 %v3420_v24, %v2626_v23  ;;  %1829 = vmatpush.bf16.msrb.mxu3 %v3171_v27  ;;  %v3271_v23 = vor.u32 %v3576_v17, %v3268_v18  ;;  %v2727_v24 = vor.u32 %v3440_v19, %v2724_v20  ;;  %v2436_v26 = vld [vmem:[#allocation8 + $0x120] sm:$0xf0] }
  0x4c   :  { %v2882_v29 = vld [vmem:[#allocation8 + $0x480] sm:$0xf]  ;;  %v3432_v27 = vld [vmem:[#allocation8 + $0x304] sm:$0xf] }
  0x4d   :  { %v3484_v30 = vld [vmem:[#allocation8 + $0x49c] sm:$0xf0]  ;;  %1802 = vmatpush.bf16.msrb.mxu1 %v2627_v31  ;;  %v3504_v31 = vld [vmem:[#allocation8 + $0x544] sm:$0xf] }
  0x4e   :  { %v3348_v32 = vld [vmem:[#allocation8 + $0x5c] sm:$0xf0]  ;;  %v2883_v37 = vor.u32 %v3484_v30, %v2882_v29  ;;  %v2439_v29 = vor.u32 %v3368_v25, %v2436_v26  ;;  %v2916_v56 = vld [vmem:[#allocation8 + $0x4e0] sm:$0xf0] }
  0x4f   :  { %v3138_v33 = vld [vmem:[#allocation8 + $0x680] sm:$0xf]  ;;  %v2339_v39 = vor.u32 %v3348_v32, %v2338_v28  ;;  %v2692_v28 = vld [vmem:[#allocation8 + $0x320] sm:$0xf0] }
  0x50   :  { %v3548_v34 = vld [vmem:[#allocation8 + $0x69c] sm:$0xf0]  ;;  %1816 = vmatpush.bf16.msrb.mxu2 %v2883_v37  ;;  %v2695_v30 = vor.u32 %v3432_v27, %v2692_v28  ;;  %v2980_v32 = vld [vmem:[#allocation8 + $0x560] sm:$0xf0]  ;;  %v107_v27 = vld [vmem:[#allocation7] sm:$0xf] }
  0x51   :  { %v2594_v35 = vld [vmem:[#allocation8 + $0x240] sm:$0xf]  ;;  %v3139_v40 = vor.u32 %v3548_v34, %v3138_v33  ;;  %1789 = vmatpush.bf16.msrb.mxu0 %v2339_v39  ;;  %v3568_v33 = vld [vmem:[#allocation8 + $0x744] sm:$0xf]  ;;  %v2983_v34 = vor.u32 %v3504_v31, %v2980_v32  ;;  %v110_v31 = vperm.slane %v107_v27, 1 }
  0x52   :  { %v3412_v36 = vld [vmem:[#allocation8 + $0x25c] sm:$0xf0]  ;;  %v3360_v37 = vld [vmem:[#allocation8 + $0xc4] sm:$0xf] }
  0x53   :  { %v2306_v38 = vld [vmem:[#allocation8] sm:$0xf]  ;;  %v2595_v44 = vor.u32 %v3412_v36, %v2594_v35  ;;  %1830 = vmatpush.bf16.msrb.mxu3 %v3139_v40  ;;  %v3236_v35 = vld [vmem:[#allocation8 + $0x760] sm:$0xf0] }
  0x54   :  { %v3340_v41 = vld [vmem:[#allocation8 + $0x1c] sm:$0xf0]  ;;  %v3239_v36 = vor.u32 %v3568_v33, %v3236_v35  ;;  %v3424_v39 = vld [vmem:[#allocation8 + $0x2c4] sm:$0xf] }
  0x55   :  { %v2850_v42 = vld [vmem:[#allocation8 + $0x440] sm:$0xf]  ;;  %v2307_v54 = vor.u32 %v3340_v41, %v2306_v38  ;;  %1803 = vmatpush.bf16.msrb.mxu1 %v2595_v44  ;;  %v2404_v38 = vld [vmem:[#allocation8 + $0xe0] sm:$0xf0] }
  0x56   :  { %v3476_v43 = vld [vmem:[#allocation8 + $0x45c] sm:$0xf0]  ;;  %v2407_v40 = vor.u32 %v3360_v37, %v2404_v38  ;;  %v2660_v41 = vld [vmem:[#allocation8 + $0x2e0] sm:$0xf0] }
  0x57   :  { %v2562_v45 = vld [vmem:[#allocation8 + $0x200] sm:$0xf]  ;;  %v2851_v53 = vor.u32 %v3476_v43, %v2850_v42  ;;  %1790 = vmatpush.bf16.msrb.mxu0 %v2307_v54  ;;  %v2663_v42 = vor.u32 %v3424_v39, %v2660_v41  ;;  %v3496_v43 = vld [vmem:[#allocation8 + $0x504] sm:$0xf]  ;;  %v3397_v41 = vld [vmem:[#allocation8 + $0x1e4] sm:$0xf0] }
  0x58   :  { %v3106_v46 = vld [vmem:[#allocation8 + $0x640] sm:$0xf]  ;;  %v2948_v44 = vld [vmem:[#allocation8 + $0x520] sm:$0xf0] }
  0x59   :  { %v3540_v47 = vld [vmem:[#allocation8 + $0x65c] sm:$0xf0]  ;;  %1817 = vmatpush.bf16.msrb.mxu2 %v2851_v53  ;;  %v2628_v53 = vld [vmem:[#allocation8 + $0x2a0] sm:$0xf0] }
  0x5a   :  { %v3404_v48 = vld [vmem:[#allocation8 + $0x21c] sm:$0xf0]  ;;  %v3107_v55 = vor.u32 %v3540_v47, %v3106_v46  ;;  %v3560_v46 = vld [vmem:[#allocation8 + $0x704] sm:$0xf]  ;;  %v2631_v54 = vor.u32 %v3416_v51, %v2628_v53  ;;  %v2506_v53 = vld [vmem:[#allocation8 + $0x188] sm:$0xf] }
  0x5b   :  { %v2818_v57 = vld [vmem:[#allocation8 + $0x400] sm:$0xf]  ;;  %v2563_v60 = vor.u32 %v3404_v48, %v2562_v45  ;;  %1839 = vmatpush.bf16.msra.mxu0 %v2535_v61  ;;  %v2951_v45 = vor.u32 %v3496_v43, %v2948_v44  ;;  %v3204_v47 = vld [vmem:[#allocation8 + $0x720] sm:$0xf0]  ;;  %v111_v43 = vperm.slane %v107_v27, 2 }
  0x5c   :  { %v3468_v58 = vld [vmem:[#allocation8 + $0x41c] sm:$0xf0]  ;;  %1831 = vmatpush.bf16.msrb.mxu3 %v3107_v55  ;;  %v3207_v48 = vor.u32 %v3560_v46, %v3204_v47  ;;  %v3488_v55 = vld [vmem:[#allocation8 + $0x4c4] sm:$0xf]  ;;  %v3461_v46 = vld [vmem:[#allocation8 + $0x3e4] sm:$0xf0] }
  0x5d   :  { %v3074_v59 = vld [vmem:[#allocation8 + $0x600] sm:$0xf]  ;;  %v2819_v7 = vor.u32 %v3468_v58, %v2818_v57  ;;  %1804 = vmatpush.bf16.msrb.mxu1 %v2563_v60  ;;  %v3552_v57 = vld [vmem:[#allocation8 + $0x6c4] sm:$0xf]  ;;  %v2919_v58 = vor.u32 %v3488_v55, %v2916_v56  ;;  %v112_v47 = vperm.slane %v107_v27, 3 }
  0x5e   :  { %v3532_v62 = vld [vmem:[#allocation8 + $0x61c] sm:$0xf0]  ;;  %v3344_v61 = vld [vmem:[#allocation8 + $0x44] sm:$0xf] }
  0x5f   :  { %v3075_v8 = vor.u32 %v3532_v62, %v3074_v59  ;;  %1818 = vmatpush.bf16.msrb.mxu2 %v2819_v7  ;;  %1840 = vmatpush.bf16.msra.mxu0 %v2503_v10  ;;  %v3172_v59 = vld [vmem:[#allocation8 + $0x6e0] sm:$0xf0] }
  0x60   :  { %v3175_v60 = vor.u32 %v3552_v57, %v3172_v59  ;;  %v2340_v62 = vld [vmem:[#allocation8 + $0x60] sm:$0xf0]  ;;  %v2762_v57 = vld [vmem:[#allocation8 + $0x388] sm:$0xf] }
  0x61   :  { %1853 = vmatpush.bf16.msra.mxu1 %v2791_v1  ;;  %1832 = vmatpush.bf16.msrb.mxu3 %v3075_v8  ;;  %v2343_v63 = vor.u32 %v3344_v61, %v2340_v62  ;;  %v3408_v0 = vld [vmem:[#allocation8 + $0x244] sm:$0xf] }
  0x62   :  { %v2596_v1 = vld [vmem:[#allocation8 + $0x260] sm:$0xf0] }
  0x63   :  { %1867 = vmatpush.bf16.msra.mxu2 %v3047_v9  ;;  %1841 = vmatpush.bf16.msra.mxu0 %v2471_v22  ;;  %v2599_v2 = vor.u32 %v3408_v0, %v2596_v1  ;;  %v3480_v3 = vld [vmem:[#allocation8 + $0x484] sm:$0xf]  ;;  %v3050_v0 = vld [vmem:[#allocation8 + $0x5c8] sm:$0xf] }
  0x64   :  { %v2884_v4 = vld [vmem:[#allocation8 + $0x4a0] sm:$0xf0]  ;;  %v3525_v1 = vld [vmem:[#allocation8 + $0x5e4] sm:$0xf0] }
  0x65   :  { %1881 = vmatpush.bf16.msra.mxu3 %v3303_v11  ;;  %1854 = vmatpush.bf16.msra.mxu1 %v2759_v15  ;;  %v3544_v5 = vld [vmem:[#allocation8 + $0x684] sm:$0xf]  ;;  %v2887_v6 = vor.u32 %v3480_v3, %v2884_v4 }
  0x66   :  { %v3140_v7 = vld [vmem:[#allocation8 + $0x6a0] sm:$0xf0] }
  0x67   :  { %1868 = vmatpush.bf16.msra.mxu2 %v3015_v21  ;;  %1842 = vmatpush.bf16.msra.mxu0 %v2439_v29  ;;  %v3143_v8 = vor.u32 %v3544_v5, %v3140_v7  ;;  %v3336_v9 = vld [vmem:[#allocation8 + $0x4] sm:$0xf]  ;;  %v109_v29 = vperm.slane %v107_v27, 0  ;;  %v3589_v5 = vld [vmem:[#allocation8 + $0x7e4] sm:$0xf0] }
  0x68   :  { %v2308_v10 = vld [vmem:[#allocation8 + $0x20] sm:$0xf0]  ;;  %v3381_v7 = vld [vmem:[#allocation8 + $0x164] sm:$0xf0] }
  0x69   :  { %1882 = vmatpush.bf16.msra.mxu3 %v3271_v23  ;;  %1855 = vmatpush.bf16.msra.mxu1 %v2727_v24  ;;  %v3400_v11 = vld [vmem:[#allocation8 + $0x204] sm:$0xf]  ;;  %v2311_v12 = vor.u32 %v3336_v9, %v2308_v10  ;;  %v2730_v10 = vld [vmem:[#allocation8 + $0x348] sm:$0xf] }
  0x6a   :  { %v2564_v13 = vld [vmem:[#allocation8 + $0x220] sm:$0xf0]  ;;  %v3437_v27 = vld [vmem:[#allocation8 + $0x324] sm:$0xf0] }
  0x6b   :  { %1869 = vmatpush.bf16.msra.mxu2 %v2983_v34  ;;  %1843 = vmatpush.bf16.msra.mxu0 %v2407_v40  ;;  %v2567_v14 = vor.u32 %v3400_v11, %v2564_v13  ;;  %v3472_v15 = vld [vmem:[#allocation8 + $0x444] sm:$0xf]  ;;  %v2538_v40 = vld [vmem:[#allocation8 + $0x1c8] sm:$0xf] }
  0x6c   :  { %v2852_v16 = vld [vmem:[#allocation8 + $0x460] sm:$0xf0]  ;;  %v2539_v50 = vor.u32 %v3397_v41, %v2538_v40  ;;  %v3445_v11 = vld [vmem:[#allocation8 + $0x364] sm:$0xf0] }
  0x6d   :  { %1856 = vmatpush.bf16.msra.mxu1 %v2695_v30  ;;  %1883 = vmatpush.bf16.msra.mxu3 %v3239_v36  ;;  %v3536_v17 = vld [vmem:[#allocation8 + $0x644] sm:$0xf]  ;;  %v2855_v19 = vor.u32 %v3472_v15, %v2852_v16 }
  0x6e   :  { %v3108_v18 = vld [vmem:[#allocation8 + $0x660] sm:$0xf0] }
  0x6f   :  { %1870 = vmatpush.bf16.msra.mxu2 %v2951_v45  ;;  %1844 = vmatpush.bf16.msra.mxu0 %v2375_v52  ;;  %v3111_v20 = vor.u32 %v3536_v17, %v3108_v18  ;;  %v3464_v21 = vld [vmem:[#allocation8 + $0x404] sm:$0xf]  ;;  %v2794_v45 = vld [vmem:[#allocation8 + $0x3c8] sm:$0xf] }
  0x70   :  { %v2820_v22 = vld [vmem:[#allocation8 + $0x420] sm:$0xf0]  ;;  %v2795_v52 = vor.u32 %v3461_v46, %v2794_v45  ;;  %v3018_v18 = vld [vmem:[#allocation8 + $0x588] sm:$0xf] }
  0x71   :  { %1857 = vmatpush.bf16.msra.mxu1 %v2663_v42  ;;  %1884 = vmatpush.bf16.msra.mxu3 %v3207_v48  ;;  %v2823_v23 = vor.u32 %v3464_v21, %v2820_v22  ;;  %v3528_v24 = vld [vmem:[#allocation8 + $0x604] sm:$0xf]  ;;  %v2731_v22 = vor.u32 %v3445_v11, %v2730_v10  ;;  %v3210_v46 = vld [vmem:[#allocation8 + $0x708] sm:$0xf] }
  0x72   :  { %v3076_v25 = vld [vmem:[#allocation8 + $0x620] sm:$0xf0]  ;;  %v2314_v10 = vld [vmem:[#allocation8 + $0x8] sm:$0xf] }
  0x73   :  { %1871 = vmatpush.bf16.msra.mxu2 %v2919_v58  ;;  %1845 = vmatpush.bf16.msra.mxu0 %v2343_v63  ;;  %v3079_v26 = vor.u32 %v3528_v24, %v3076_v25  ;;  %v3453_v58 = vld [vmem:[#allocation8 + $0x3a4] sm:$0xf0] }
  0x74   :  { %v2763_v4 = vor.u32 %v3453_v58, %v2762_v57  ;;  %v2442_v24 = vld [vmem:[#allocation8 + $0x108] sm:$0xf] }
  0x75   :  { %1858 = vmatpush.bf16.msra.mxu1 %v2631_v54  ;;  %1885 = vmatpush.bf16.msra.mxu3 %v3175_v60  ;;  %v3389_v54 = vld [vmem:[#allocation8 + $0x1a4] sm:$0xf0] }
  0x76   :  { %v2507_v63 = vor.u32 %v3389_v54, %v2506_v53  ;;  %v3373_v25 = vld [vmem:[#allocation8 + $0x124] sm:$0xf0] }
  0x77   :  { %1872 = vmatpush.bf16.msra.mxu2 %v2887_v6  ;;  %1846 = vmatpush.bf16.msra.mxu0 %v2311_v12  ;;  %v2474_v6 = vld [vmem:[#allocation8 + $0x148] sm:$0xf] }
  0x78   :  { %v2475_v17 = vor.u32 %v3381_v7, %v2474_v6  ;;  %v3493_v57 = vld [vmem:[#allocation8 + $0x4e4] sm:$0xf0] }
  0x79   :  { %1859 = vmatpush.bf16.msra.mxu1 %v2599_v2  ;;  %1886 = vmatpush.bf16.msra.mxu3 %v3143_v8  ;;  %v3306_v2 = vld [vmem:[#allocation8 + $0x7c8] sm:$0xf] }
  0x7a   :  { %v3307_v16 = vor.u32 %v3589_v5, %v3306_v2  ;;  %v3485_v5 = vld [vmem:[#allocation8 + $0x4a4] sm:$0xf0] }
  0x7b   :  { %1873 = vmatpush.bf16.msra.mxu2 %v2855_v19  ;;  %v3517_v19 = vld [vmem:[#allocation8 + $0x5a4] sm:$0xf0] }
  0x7c   :  { %v3146_v6 = vld [vmem:[#allocation8 + $0x688] sm:$0xf] }
  0x7d   :  { %1860 = vmatpush.bf16.msra.mxu1 %v2567_v14  ;;  %1887 = vmatpush.bf16.msra.mxu3 %v3111_v20  ;;  %v3051_v14 = vor.u32 %v3525_v1, %v3050_v0  ;;  %v3274_v20 = vld [vmem:[#allocation8 + $0x788] sm:$0xf] }
  0x7e   :  { %v2602_v0 = vld [vmem:[#allocation8 + $0x248] sm:$0xf] }
  0x7f   :  { %1874 = vmatpush.bf16.msra.mxu2 %v2823_v23  ;;  %v3581_v23 = vld [vmem:[#allocation8 + $0x7a4] sm:$0xf0] }
  0x80   :  { %v3413_v1 = vld [vmem:[#allocation8 + $0x264] sm:$0xf0] }
  0x81   :  { %1888 = vmatpush.bf16.msra.mxu3 %v3079_v26  ;;  %v2698_v26 = vld [vmem:[#allocation8 + $0x308] sm:$0xf] }
  0x82   :  { %v3341_v11 = vld [vmem:[#allocation8 + $0x24] sm:$0xf0] }
  0xa0   :  { %v170_v28 = vpop.f32.mrf.mxu0 }
  0xa1   :  { %v184_v30 = vpop.f32.mrf.mxu1  ;;  %v171_v32 = vadd.f32 %v170_v28, %v109_v29  ;;  %v3019_v28 = vor.u32 %v3517_v19, %v3018_v18  ;;  %v3457_v18 = vld [vmem:[#allocation8 + $0x3cc] sm:$0xf] }
  0xa2   :  { %v185_v33 = vadd.f32 %v184_v30, %v110_v31  ;;  %v2443_v30 = vor.u32 %v3373_v25, %v2442_v24  ;;  %v2796_v19 = vld [vmem:[#allocation8 + $0x3e8] sm:$0xf0]  ;;  %v2315_v24 = vor.u32 %v3341_v11, %v2314_v10 }
  0xa3   :  { %v217_v37 = vmax.f32 %v171_v32, 0.0  ;;  %v3509_v32 = vld [vmem:[#allocation8 + $0x564] sm:$0xf0]  ;;  %v3361_v10 = vld [vmem:[#allocation8 + $0xcc] sm:$0xf] }
  0xa4   :  { %v218_v42 = vmax.f32 %v185_v33, 0.0  ;;  %v2699_v33 = vor.u32 %v3437_v27, %v2698_v26  ;;  %v3114_v26 = vld [vmem:[#allocation8 + $0x648] sm:$0xf]  ;;  %v2412_v11 = vld [vmem:[#allocation8 + $0xe8] sm:$0xf0] }
  0xa5   :  { %v3541_v27 = vld [vmem:[#allocation8 + $0x664] sm:$0xf0] }
  0xa8   :  { %v198_v34 = vpop.f32.mrf.mxu2  ;;  %v172_v36 = vpop.f32.mrf.mxu0 }
  0xa9   :  { %v212_v35 = vpop.f32.mrf.mxu3  ;;  %v173_v38 = vadd.f32 %v172_v36, %v109_v29  ;;  %v186_v39 = vpop.f32.mrf.mxu1  ;;  %v199_v55 = vadd.f32 %v198_v34, %v111_v43  ;;  %v3275_v29 = vor.u32 %v3581_v23, %v3274_v20  ;;  %v3242_v34 = vld [vmem:[#allocation8 + $0x748] sm:$0xf] }
  0xaa   :  { %v187_v44 = vadd.f32 %v186_v39, %v110_v31  ;;  %v213_v59 = vadd.f32 %v212_v35, %v112_v47  ;;  %v2986_v31 = vld [vmem:[#allocation8 + $0x548] sm:$0xf] }
  0xab   :  { %v221_v48 = vmax.f32 %v173_v38, 0.0  ;;  %v219_v8 = vmax.f32 %v199_v55, 0.0  ;;  %v3573_v35 = vld [vmem:[#allocation8 + $0x764] sm:$0xf0]  ;;  %v2987_v40 = vor.u32 %v3509_v32, %v2986_v31  ;;  %v2508_v32 = vld [vmem:[#allocation8 + $0x1a8] sm:$0xf0] }
  0xac   :  { %v222_v49 = vmax.f32 %v187_v44, 0.0  ;;  %v220_v12 = vmax.f32 %v213_v59, 0.0  ;;  %v2410_v36 = vld [vmem:[#allocation8 + $0xc8] sm:$0xf]  ;;  %v3243_v41 = vor.u32 %v3573_v35, %v3242_v34  ;;  %v2764_v34 = vld [vmem:[#allocation8 + $0x3a8] sm:$0xf0]  ;;  %v3115_v35 = vor.u32 %v3541_v27, %v3114_v26 }
  0xad   :  { %v3821_v51 = vpack.c.bf16 %v221_v48, %v217_v37  ;;  %v3365_v37 = vld [vmem:[#allocation8 + $0xe4] sm:$0xf0]  ;;  %v3417_v26 = vld [vmem:[#allocation8 + $0x28c] sm:$0xf] }
  0xae   :  { %v3823_v56 = vpack.c.bf16 %v222_v49, %v218_v42  ;;  %v2666_v38 = vld [vmem:[#allocation8 + $0x2c8] sm:$0xf]  ;;  %v2411_v44 = vor.u32 %v3365_v37, %v2410_v36  ;;  %v2636_v27 = vld [vmem:[#allocation8 + $0x2a8] sm:$0xf0] }
  0xaf   :  { %1791 = vmatmul.bf16.vlgmr.msrb.gmra.mxu0 %v3821_v51  ;;  %v3429_v39 = vld [vmem:[#allocation8 + $0x2e4] sm:$0xf0] }
  0xb0   :  { %v200_v60 = vpop.f32.mrf.mxu2  ;;  %1805 = vmatmul.bf16.vlgmr.msrb.gmra.mxu1 %v3823_v56  ;;  %1895 = vmatpush.bf16.msrb.mxu0 %v2539_v50  ;;  %v2954_v42 = vld [vmem:[#allocation8 + $0x508] sm:$0xf]  ;;  %v2667_v45 = vor.u32 %v3429_v39, %v2666_v38 }
  0xb1   :  { %v201_v61 = vadd.f32 %v200_v60, %v111_v43  ;;  %v214_v62 = vpop.f32.mrf.mxu3  ;;  %1909 = vmatpush.bf16.msrb.mxu1 %v2795_v52  ;;  %v3501_v43 = vld [vmem:[#allocation8 + $0x524] sm:$0xf0] }
  0xb2   :  { %v215_v3 = vadd.f32 %v214_v62, %v112_v47  ;;  %v3565_v47 = vld [vmem:[#allocation8 + $0x724] sm:$0xf0]  ;;  %v2955_v53 = vor.u32 %v3501_v43, %v2954_v42 }
  0xb3   :  { %v223_v9 = vmax.f32 %v201_v61, 0.0  ;;  %v2378_v48 = vld [vmem:[#allocation8 + $0x88] sm:$0xf]  ;;  %v3211_v54 = vor.u32 %v3565_v47, %v3210_v46  ;;  %v3377_v46 = vld [vmem:[#allocation8 + $0x14c] sm:$0xf] }
  0xb4   :  { %v224_v13 = vmax.f32 %v215_v3, 0.0  ;;  %1896 = vmatpush.bf16.msrb.mxu0 %v2507_v63  ;;  %v3357_v49 = vld [vmem:[#allocation8 + $0xa4] sm:$0xf0] }
  0xb5   :  { %v3827_v15 = vpack.c.bf16 %v223_v9, %v219_v8  ;;  %1910 = vmatpush.bf16.msrb.mxu1 %v2763_v4  ;;  %v2634_v50 = vld [vmem:[#allocation8 + $0x288] sm:$0xf]  ;;  %v2379_v58 = vor.u32 %v3357_v49, %v2378_v48  ;;  %v2603_v8 = vor.u32 %v3413_v1, %v2602_v0  ;;  %v2476_v48 = vld [vmem:[#allocation8 + $0x168] sm:$0xf0] }
  0xb6   :  { %v3829_v21 = vpack.c.bf16 %v224_v13, %v220_v12  ;;  %v3421_v52 = vld [vmem:[#allocation8 + $0x2a4] sm:$0xf0]  ;;  %v3441_v49 = vld [vmem:[#allocation8 + $0x34c] sm:$0xf] }
  0xb7   :  { %1819 = vmatmul.bf16.vlgmr.msrb.gmra.mxu2 %v3827_v15  ;;  %v2922_v55 = vld [vmem:[#allocation8 + $0x4c8] sm:$0xf]  ;;  %v2635_v59 = vor.u32 %v3421_v52, %v2634_v50  ;;  %v2732_v50 = vld [vmem:[#allocation8 + $0x368] sm:$0xf0] }
  0xb8   :  { %1833 = vmatmul.bf16.vlgmr.msrb.gmra.mxu3 %v3829_v21  ;;  %1923 = vmatpush.bf16.msrb.mxu2 %v3051_v14  ;;  %v3178_v60 = vld [vmem:[#allocation8 + $0x6c8] sm:$0xf]  ;;  %v2923_v2 = vor.u32 %v3493_v57, %v2922_v55  ;;  %v3393_v14 = vld [vmem:[#allocation8 + $0x1cc] sm:$0xf] }
  0xb9   :  { %1937 = vmatpush.bf16.msrb.mxu3 %v3307_v16  ;;  %1897 = vmatpush.bf16.msrb.mxu0 %v2475_v17  ;;  %v3557_v61 = vld [vmem:[#allocation8 + $0x6e4] sm:$0xf0]  ;;  %v2540_v17 = vld [vmem:[#allocation8 + $0x1e8] sm:$0xf0] }
  0xba   :  { %1911 = vmatpush.bf16.msrb.mxu1 %v2731_v22  ;;  %v2346_v62 = vld [vmem:[#allocation8 + $0x48] sm:$0xf]  ;;  %v3179_v3 = vor.u32 %v3557_v61, %v3178_v60  ;;  %v3513_v55 = vld [vmem:[#allocation8 + $0x58c] sm:$0xf] }
  0xbb   :  { %v3349_v63 = vld [vmem:[#allocation8 + $0x64] sm:$0xf0]  ;;  %v3020_v57 = vld [vmem:[#allocation8 + $0x5a8] sm:$0xf0] }
  0xbc   :  { %1924 = vmatpush.bf16.msrb.mxu2 %v3019_v28  ;;  %v2890_v4 = vld [vmem:[#allocation8 + $0x488] sm:$0xf]  ;;  %v2347_v7 = vor.u32 %v3349_v63, %v2346_v62  ;;  %v2543_v28 = vor.u32 %v3393_v14, %v2540_v17  ;;  %v3577_v60 = vld [vmem:[#allocation8 + $0x78c] sm:$0xf] }
  0xbd   :  { %1938 = vmatpush.bf16.msrb.mxu3 %v3275_v29  ;;  %1898 = vmatpush.bf16.msrb.mxu0 %v2443_v30  ;;  %v3549_v9 = vld [vmem:[#allocation8 + $0x6a4] sm:$0xf0]  ;;  %v2891_v16 = vor.u32 %v3485_v5, %v2890_v4  ;;  %v2799_v29 = vor.u32 %v3457_v18, %v2796_v19  ;;  %v3385_v30 = vld [vmem:[#allocation8 + $0x18c] sm:$0xf]  ;;  %v2415_v19 = vor.u32 %v3361_v10, %v2412_v11 }
  0xbe   :  { %1912 = vmatpush.bf16.msrb.mxu1 %v2699_v33  ;;  %v2570_v12 = vld [vmem:[#allocation8 + $0x208] sm:$0xf]  ;;  %v3147_v20 = vor.u32 %v3549_v9, %v3146_v6  ;;  %v3449_v33 = vld [vmem:[#allocation8 + $0x38c] sm:$0xf]  ;;  %v2511_v42 = vor.u32 %v3385_v30, %v2508_v32 }
  0xbf   :  { %1847 = vmatmul.bf16.vlgmr.msra.gmra.mxu0 %v3821_v51  ;;  %v3405_v13 = vld [vmem:[#allocation8 + $0x224] sm:$0xf0]  ;;  %v2767_v43 = vor.u32 %v3449_v33, %v2764_v34  ;;  %v3276_v61 = vld [vmem:[#allocation8 + $0x7a8] sm:$0xf0]  ;;  %v2639_v33 = vor.u32 %v3417_v26, %v2636_v27  ;;  %v2738_v27 = vld [vmem:[#allocation8 + $0x350] sm:$0xf] }
  0xc0   :  { %1925 = vmatpush.bf16.msrb.mxu2 %v2987_v40  ;;  %1861 = vmatmul.bf16.vlgmr.msra.gmra.mxu1 %v3823_v56  ;;  %v2858_v22 = vld [vmem:[#allocation8 + $0x448] sm:$0xf]  ;;  %v2571_v25 = vor.u32 %v3405_v13, %v2570_v12  ;;  %v3521_v40 = vld [vmem:[#allocation8 + $0x5cc] sm:$0xf] }
  0xc1   :  { %1939 = vmatpush.bf16.msrb.mxu3 %v3243_v41  ;;  %1899 = vmatpush.bf16.msrb.mxu0 %v2411_v44  ;;  %v3477_v23 = vld [vmem:[#allocation8 + $0x464] sm:$0xf0]  ;;  %v3052_v41 = vld [vmem:[#allocation8 + $0x5e8] sm:$0xf0] }
  0xc2   :  { %1913 = vmatpush.bf16.msrb.mxu1 %v2667_v45  ;;  %v2859_v31 = vor.u32 %v3477_v23, %v2858_v22  ;;  %v2826_v36 = vld [vmem:[#allocation8 + $0x408] sm:$0xf]  ;;  %v3585_v44 = vld [vmem:[#allocation8 + $0x7cc] sm:$0xf] }
  0xc3   :  { %v3469_v37 = vld [vmem:[#allocation8 + $0x424] sm:$0xf0]  ;;  %v3308_v45 = vld [vmem:[#allocation8 + $0x7e8] sm:$0xf0] }
  0xc4   :  { %1926 = vmatpush.bf16.msrb.mxu2 %v2955_v53  ;;  %v3082_v38 = vld [vmem:[#allocation8 + $0x608] sm:$0xf]  ;;  %v2827_v47 = vor.u32 %v3469_v37, %v2826_v36  ;;  %v3055_v53 = vor.u32 %v3521_v40, %v3052_v41  ;;  %v3369_v62 = vld [vmem:[#allocation8 + $0x10c] sm:$0xf] }
  0xc5   :  { %1940 = vmatpush.bf16.msrb.mxu3 %v3211_v54  ;;  %1900 = vmatpush.bf16.msrb.mxu0 %v2379_v58  ;;  %v3533_v39 = vld [vmem:[#allocation8 + $0x624] sm:$0xf0]  ;;  %v3311_v54 = vor.u32 %v3585_v44, %v3308_v45  ;;  %v2479_v58 = vor.u32 %v3377_v46, %v2476_v48  ;;  %v2444_v63 = vld [vmem:[#allocation8 + $0x128] sm:$0xf0] }
  0xc6   :  { %1914 = vmatpush.bf16.msrb.mxu1 %v2635_v59  ;;  %v3083_v52 = vor.u32 %v3533_v39, %v3082_v38  ;;  %v2735_v59 = vor.u32 %v3441_v49, %v2732_v50  ;;  %v3433_v0 = vld [vmem:[#allocation8 + $0x30c] sm:$0xf]  ;;  %v2447_v6 = vor.u32 %v3369_v62, %v2444_v63 }
  0xc7   :  { %1875 = vmatmul.bf16.vlgmr.msra.gmra.mxu2 %v3827_v15  ;;  %v2700_v1 = vld [vmem:[#allocation8 + $0x328] sm:$0xf0] }
  0xc8   :  { %1889 = vmatmul.bf16.vlgmr.msra.gmra.mxu3 %v3829_v21  ;;  %1927 = vmatpush.bf16.msrb.mxu2 %v2923_v2  ;;  %v3023_v2 = vor.u32 %v3513_v55, %v3020_v57  ;;  %v3505_v4 = vld [vmem:[#allocation8 + $0x54c] sm:$0xf]  ;;  %v3398_v55 = vld [vmem:[#allocation8 + $0x1ec] sm:$0xf0] }
  0xc9   :  { %1941 = vmatpush.bf16.msrb.mxu3 %v3179_v3  ;;  %1901 = vmatpush.bf16.msrb.mxu0 %v2347_v7  ;;  %v3279_v3 = vor.u32 %v3577_v60, %v3276_v61  ;;  %v2988_v5 = vld [vmem:[#allocation8 + $0x568] sm:$0xf0]  ;;  %v2703_v7 = vor.u32 %v3433_v0, %v2700_v1  ;;  %v2802_v57 = vld [vmem:[#allocation8 + $0x3d0] sm:$0xf] }
  0xca   :  { %1915 = vmatpush.bf16.msrb.mxu1 %v2603_v8  ;;  %v3569_v8 = vld [vmem:[#allocation8 + $0x74c] sm:$0xf]  ;;  %v2991_v14 = vor.u32 %v3505_v4, %v2988_v5  ;;  %v2514_v4 = vld [vmem:[#allocation8 + $0x190] sm:$0xf] }
  0xcb   :  { %v3244_v9 = vld [vmem:[#allocation8 + $0x768] sm:$0xf0] }
  0xcc   :  { %1928 = vmatpush.bf16.msrb.mxu2 %v2891_v16  ;;  %v3425_v12 = vld [vmem:[#allocation8 + $0x2cc] sm:$0xf]  ;;  %v3247_v16 = vor.u32 %v3569_v8, %v3244_v9  ;;  %v3454_v8 = vld [vmem:[#allocation8 + $0x3ac] sm:$0xf0] }
  0xcd   :  { %1942 = vmatpush.bf16.msrb.mxu3 %v3147_v20  ;;  %1902 = vmatpush.bf16.msrb.mxu0 %v2315_v24  ;;  %v2668_v13 = vld [vmem:[#allocation8 + $0x2e8] sm:$0xf0] }
  0xce   :  { %1916 = vmatpush.bf16.msrb.mxu1 %v2571_v25  ;;  %v3497_v17 = vld [vmem:[#allocation8 + $0x50c] sm:$0xf]  ;;  %v2671_v20 = vor.u32 %v3425_v12, %v2668_v13 }
  0xcf   :  { %v2956_v18 = vld [vmem:[#allocation8 + $0x528] sm:$0xf0] }
  0xd0   :  { %1929 = vmatpush.bf16.msrb.mxu2 %v2859_v31  ;;  %1903 = vmatmul.bf16.vlgmr.msrb.gmra.mxu0 %v3821_v51  ;;  %v3561_v22 = vld [vmem:[#allocation8 + $0x70c] sm:$0xf] }
  0xd1   :  { %1951 = vmatpush.bf16.msra.mxu0 %v2543_v28  ;;  %1943 = vmatpush.bf16.msrb.mxu3 %v3115_v35  ;;  %v3212_v23 = vld [vmem:[#allocation8 + $0x728] sm:$0xf0]  ;;  %v2959_v28 = vor.u32 %v3497_v17, %v2956_v18 }
  0xd2   :  { %1965 = vmatpush.bf16.msra.mxu1 %v2799_v29  ;;  %v3353_v24 = vld [vmem:[#allocation8 + $0x8c] sm:$0xf]  ;;  %v3215_v29 = vor.u32 %v3561_v22, %v3212_v23  ;;  %v2482_v23 = vld [vmem:[#allocation8 + $0x150] sm:$0xf] }
  0xd3   :  { %1917 = vmatmul.bf16.vlgmr.msrb.gmra.mxu1 %v3823_v56  ;;  %v2380_v25 = vld [vmem:[#allocation8 + $0xa8] sm:$0xf0] }
  0xd4   :  { %1930 = vmatpush.bf16.msrb.mxu2 %v2827_v47  ;;  %v3489_v30 = vld [vmem:[#allocation8 + $0x4cc] sm:$0xf]  ;;  %v2383_v32 = vor.u32 %v3353_v24, %v2380_v25  ;;  %v3382_v24 = vld [vmem:[#allocation8 + $0x16c] sm:$0xf0] }
  0xd5   :  { %1952 = vmatpush.bf16.msra.mxu0 %v2511_v42  ;;  %1944 = vmatpush.bf16.msrb.mxu3 %v3083_v52  ;;  %v2924_v31 = vld [vmem:[#allocation8 + $0x4e8] sm:$0xf0] }
  0xd6   :  { %1966 = vmatpush.bf16.msra.mxu1 %v2767_v43  ;;  %v3553_v34 = vld [vmem:[#allocation8 + $0x6cc] sm:$0xf]  ;;  %v2927_v40 = vor.u32 %v3489_v30, %v2924_v31  ;;  %v3026_v30 = vld [vmem:[#allocation8 + $0x590] sm:$0xf] }
  0xd7   :  { %1931 = vmatmul.bf16.vlgmr.msrb.gmra.mxu2 %v3827_v15  ;;  %v3180_v35 = vld [vmem:[#allocation8 + $0x6e8] sm:$0xf0]  ;;  %v3518_v31 = vld [vmem:[#allocation8 + $0x5ac] sm:$0xf0] }
  0xd8   :  { %1979 = vmatpush.bf16.msra.mxu2 %v3055_v53  ;;  %1945 = vmatmul.bf16.vlgmr.msrb.gmra.mxu3 %v3829_v21  ;;  %v3345_v36 = vld [vmem:[#allocation8 + $0x4c] sm:$0xf]  ;;  %v3183_v41 = vor.u32 %v3553_v34, %v3180_v35  ;;  %v2546_v53 = vld [vmem:[#allocation8 + $0x1d0] sm:$0xf] }
  0xd9   :  { %1993 = vmatpush.bf16.msra.mxu3 %v3311_v54  ;;  %1953 = vmatpush.bf16.msra.mxu0 %v2479_v58  ;;  %v2348_v37 = vld [vmem:[#allocation8 + $0x68] sm:$0xf0]  ;;  %v3462_v58 = vld [vmem:[#allocation8 + $0x3ec] sm:$0xf0] }
  0xda   :  { %1967 = vmatpush.bf16.msra.mxu1 %v2735_v59  ;;  %v3409_v38 = vld [vmem:[#allocation8 + $0x24c] sm:$0xf]  ;;  %v2351_v45 = vor.u32 %v3345_v36, %v2348_v37  ;;  %v3582_v34 = vld [vmem:[#allocation8 + $0x7ac] sm:$0xf0] }
  0xdb   :  { %v2604_v39 = vld [vmem:[#allocation8 + $0x268] sm:$0xf0]  ;;  %v2450_v36 = vld [vmem:[#allocation8 + $0x110] sm:$0xf] }
  0xdc   :  { %1980 = vmatpush.bf16.msra.mxu2 %v3023_v2  ;;  %v3481_v42 = vld [vmem:[#allocation8 + $0x48c] sm:$0xf]  ;;  %v2607_v46 = vor.u32 %v3409_v38, %v2604_v39  ;;  %v2547_v2 = vor.u32 %v3398_v55, %v2546_v53  ;;  %v3374_v37 = vld [vmem:[#allocation8 + $0x12c] sm:$0xf0]  ;;  %v3027_v38 = vor.u32 %v3518_v31, %v3026_v30  ;;  %v2548_v30 = vld [vmem:[#allocation8 + $0x1f0] sm:$0xf0] }
  0xdd   :  { %1994 = vmatpush.bf16.msra.mxu3 %v3279_v3  ;;  %1954 = vmatpush.bf16.msra.mxu0 %v2447_v6  ;;  %v2892_v43 = vld [vmem:[#allocation8 + $0x4a8] sm:$0xf0]  ;;  %v2803_v3 = vor.u32 %v3462_v58, %v2802_v57  ;;  %v3390_v6 = vld [vmem:[#allocation8 + $0x1ac] sm:$0xf0]  ;;  %v3458_v31 = vld [vmem:[#allocation8 + $0x3d4] sm:$0xf] }
  0xde   :  { %1968 = vmatpush.bf16.msra.mxu1 %v2703_v7  ;;  %v3545_v44 = vld [vmem:[#allocation8 + $0x68c] sm:$0xf]  ;;  %v2895_v54 = vor.u32 %v3481_v42, %v2892_v43  ;;  %v2770_v7 = vld [vmem:[#allocation8 + $0x390] sm:$0xf]  ;;  %v2515_v17 = vor.u32 %v3390_v6, %v2514_v4 }
  0xdf   :  { %v3148_v47 = vld [vmem:[#allocation8 + $0x6a8] sm:$0xf0]  ;;  %v2771_v18 = vor.u32 %v3454_v8, %v2770_v7  ;;  %v2706_v39 = vld [vmem:[#allocation8 + $0x310] sm:$0xf] }
  0xe0   :  { %1981 = vmatpush.bf16.msra.mxu2 %v2991_v14  ;;  %v3337_v48 = vld [vmem:[#allocation8 + $0xc] sm:$0xf]  ;;  %v3151_v59 = vor.u32 %v3545_v44, %v3148_v47  ;;  %v3058_v14 = vld [vmem:[#allocation8 + $0x5d0] sm:$0xf]  ;;  %v2451_v44 = vor.u32 %v3374_v37, %v2450_v36 }
  0xe1   :  { %1995 = vmatpush.bf16.msra.mxu3 %v3247_v16  ;;  %1955 = vmatpush.bf16.msra.mxu0 %v2415_v19  ;;  %v2316_v49 = vld [vmem:[#allocation8 + $0x28] sm:$0xf0]  ;;  %v3526_v16 = vld [vmem:[#allocation8 + $0x5ec] sm:$0xf0] }
  0xe2   :  { %1969 = vmatpush.bf16.msra.mxu1 %v2671_v20  ;;  %v3401_v50 = vld [vmem:[#allocation8 + $0x20c] sm:$0xf]  ;;  %v2319_v62 = vor.u32 %v3337_v48, %v2316_v49  ;;  %v3314_v19 = vld [vmem:[#allocation8 + $0x7d0] sm:$0xf]  ;;  %v3059_v26 = vor.u32 %v3526_v16, %v3058_v14 }
  0xe3   :  { %v2572_v52 = vld [vmem:[#allocation8 + $0x228] sm:$0xf0]  ;;  %v3590_v20 = vld [vmem:[#allocation8 + $0x7ec] sm:$0xf0] }
  0xe4   :  { %1982 = vmatpush.bf16.msra.mxu2 %v2959_v28  ;;  %v3473_v60 = vld [vmem:[#allocation8 + $0x44c] sm:$0xf]  ;;  %v2575_v63 = vor.u32 %v3401_v50, %v2572_v52  ;;  %v3446_v28 = vld [vmem:[#allocation8 + $0x36c] sm:$0xf0] }
  0xe5   :  { %1996 = vmatpush.bf16.msra.mxu3 %v3215_v29  ;;  %1956 = vmatpush.bf16.msra.mxu0 %v2383_v32  ;;  %v2860_v61 = vld [vmem:[#allocation8 + $0x468] sm:$0xf0]  ;;  %v3315_v29 = vor.u32 %v3590_v20, %v3314_v19  ;;  %v2483_v32 = vor.u32 %v3382_v24, %v2482_v23  ;;  %v2739_v35 = vor.u32 %v3446_v28, %v2738_v27  ;;  %v2994_v42 = vld [vmem:[#allocation8 + $0x550] sm:$0xf] }
  0xe6   :  { %1970 = vmatpush.bf16.msra.mxu1 %v2639_v33  ;;  %v3537_v0 = vld [vmem:[#allocation8 + $0x64c] sm:$0xf]  ;;  %v2863_v5 = vor.u32 %v3473_v60, %v2860_v61  ;;  %v3282_v33 = vld [vmem:[#allocation8 + $0x790] sm:$0xf] }
  0xe7   :  { %v3116_v1 = vld [vmem:[#allocation8 + $0x668] sm:$0xf0]  ;;  %v3510_v43 = vld [vmem:[#allocation8 + $0x56c] sm:$0xf0] }
  0xe8   :  { %1983 = vmatpush.bf16.msra.mxu2 %v2927_v40  ;;  %v3119_v9 = vor.u32 %v3537_v0, %v3116_v1  ;;  %v3465_v10 = vld [vmem:[#allocation8 + $0x40c] sm:$0xf]  ;;  %v3438_v40 = vld [vmem:[#allocation8 + $0x32c] sm:$0xf0]  ;;  %v2995_v50 = vor.u32 %v3510_v43, %v2994_v42 }
  0xe9   :  { %1997 = vmatpush.bf16.msra.mxu3 %v3183_v41  ;;  %1957 = vmatpush.bf16.msra.mxu0 %v2351_v45  ;;  %v2828_v11 = vld [vmem:[#allocation8 + $0x428] sm:$0xf0]  ;;  %v3283_v41 = vor.u32 %v3582_v34, %v3282_v33  ;;  %v3250_v45 = vld [vmem:[#allocation8 + $0x750] sm:$0xf]  ;;  %v2707_v47 = vor.u32 %v3438_v40, %v2706_v39  ;;  %v2804_v33 = vld [vmem:[#allocation8 + $0x3f0] sm:$0xf0] }
  0xea   :  { %1971 = vmatpush.bf16.msra.mxu1 %v2607_v46  ;;  %v3529_v12 = vld [vmem:[#allocation8 + $0x60c] sm:$0xf]  ;;  %v2831_v22 = vor.u32 %v3465_v10, %v2828_v11  ;;  %v3574_v46 = vld [vmem:[#allocation8 + $0x76c] sm:$0xf0]  ;;  %v2807_v42 = vor.u32 %v3458_v31, %v2804_v33  ;;  %v2964_v31 = vld [vmem:[#allocation8 + $0x530] sm:$0xf0] }
  0xeb   :  { %v3084_v13 = vld [vmem:[#allocation8 + $0x628] sm:$0xf0]  ;;  %v2418_v48 = vld [vmem:[#allocation8 + $0xd0] sm:$0xf]  ;;  %v3562_v33 = vld [vmem:[#allocation8 + $0x714] sm:$0xf] }
  0xec   :  { %1984 = vmatpush.bf16.msra.mxu2 %v2895_v54  ;;  %v3087_v25 = vor.u32 %v3529_v12, %v3084_v13  ;;  %v3366_v49 = vld [vmem:[#allocation8 + $0xec] sm:$0xf0]  ;;  %v3251_v54 = vor.u32 %v3574_v46, %v3250_v45  ;;  %v3450_v45 = vld [vmem:[#allocation8 + $0x394] sm:$0xf] }
  0xed   :  { %1998 = vmatpush.bf16.msra.mxu3 %v3151_v59  ;;  %1958 = vmatpush.bf16.msra.mxu0 %v2319_v62  ;;  %v2674_v52 = vld [vmem:[#allocation8 + $0x2d0] sm:$0xf]  ;;  %v2419_v58 = vor.u32 %v3366_v49, %v2418_v48  ;;  %v2772_v46 = vld [vmem:[#allocation8 + $0x3b0] sm:$0xf0] }
  0xee   :  { %1972 = vmatpush.bf16.msra.mxu1 %v2575_v63  ;;  %v3430_v53 = vld [vmem:[#allocation8 + $0x2ec] sm:$0xf0] }
  0xef   :  { %v2962_v55 = vld [vmem:[#allocation8 + $0x510] sm:$0xf]  ;;  %v2675_v61 = vor.u32 %v3430_v53, %v2674_v52  ;;  %v3522_v53 = vld [vmem:[#allocation8 + $0x5d4] sm:$0xf] }
  0xf0   :  { %1985 = vmatpush.bf16.msra.mxu2 %v2863_v5  ;;  %1959 = vmatmul.bf16.vlgmr.msra.gmra.mxu0 %v3821_v51  ;;  %v3502_v57 = vld [vmem:[#allocation8 + $0x52c] sm:$0xf0] }
  0xf1   :  { %2007 = vmatpush.bf16.msrb.mxu0 %v2547_v2  ;;  %1999 = vmatpush.bf16.msra.mxu3 %v3119_v9  ;;  %v3218_v59 = vld [vmem:[#allocation8 + $0x710] sm:$0xf]  ;;  %v2963_v0 = vor.u32 %v3502_v57, %v2962_v55  ;;  %v3586_v57 = vld [vmem:[#allocation8 + $0x7d4] sm:$0xf] }
  0xf2   :  { %2021 = vmatpush.bf16.msrb.mxu1 %v2803_v3  ;;  %v3566_v60 = vld [vmem:[#allocation8 + $0x72c] sm:$0xf0] }
  0xf3   :  { %1973 = vmatmul.bf16.vlgmr.msra.gmra.mxu1 %v3823_v56  ;;  %v2386_v62 = vld [vmem:[#allocation8 + $0x90] sm:$0xf]  ;;  %v3219_v3 = vor.u32 %v3566_v60, %v3218_v59  ;;  %v2775_v59 = vor.u32 %v3450_v45, %v2772_v46  ;;  %v3554_v45 = vld [vmem:[#allocation8 + $0x6d4] sm:$0xf] }
  0xf4   :  { %1986 = vmatpush.bf16.msra.mxu2 %v2831_v22  ;;  %v3358_v63 = vld [vmem:[#allocation8 + $0xac] sm:$0xf0]  ;;  %v3188_v46 = vld [vmem:[#allocation8 + $0x6f0] sm:$0xf0] }
  0xf5   :  { %2008 = vmatpush.bf16.msrb.mxu0 %v2515_v17  ;;  %2000 = vmatpush.bf16.msra.mxu3 %v3087_v25  ;;  %v2642_v1 = vld [vmem:[#allocation8 + $0x290] sm:$0xf]  ;;  %v2387_v6 = vor.u32 %v3358_v63, %v2386_v62  ;;  %v2484_v62 = vld [vmem:[#allocation8 + $0x170] sm:$0xf0] }
  0xf6   :  { %2022 = vmatpush.bf16.msrb.mxu1 %v2771_v18  ;;  %v3422_v2 = vld [vmem:[#allocation8 + $0x2ac] sm:$0xf0] }
  0xf7   :  { %1987 = vmatmul.bf16.vlgmr.msra.gmra.mxu2 %v3827_v15  ;;  %v2930_v4 = vld [vmem:[#allocation8 + $0x4d0] sm:$0xf]  ;;  %v2643_v9 = vor.u32 %v3422_v2, %v2642_v1  ;;  %v3442_v1 = vld [vmem:[#allocation8 + $0x354] sm:$0xf] }
  0xf8   :  { %2035 = vmatpush.bf16.msrb.mxu2 %v3059_v26  ;;  %2001 = vmatmul.bf16.vlgmr.msra.gmra.mxu3 %v3829_v21  ;;  %v3494_v5 = vld [vmem:[#allocation8 + $0x4ec] sm:$0xf0]  ;;  %v2740_v2 = vld [vmem:[#allocation8 + $0x370] sm:$0xf0] }
  0xf9   :  { %2049 = vmatpush.bf16.msrb.mxu3 %v3315_v29  ;;  %2009 = vmatpush.bf16.msrb.mxu0 %v2483_v32  ;;  %v3186_v7 = vld [vmem:[#allocation8 + $0x6d0] sm:$0xf]  ;;  %v2931_v12 = vor.u32 %v3494_v5, %v2930_v4  ;;  %v3394_v29 = vld [vmem:[#allocation8 + $0x1d4] sm:$0xf] }
  0xfa   :  { %2023 = vmatpush.bf16.msrb.mxu1 %v2739_v35  ;;  %v3558_v8 = vld [vmem:[#allocation8 + $0x6ec] sm:$0xf0]  ;;  %v2551_v40 = vor.u32 %v3394_v29, %v2548_v30  ;;  %v3514_v4 = vld [vmem:[#allocation8 + $0x594] sm:$0xf] }
  0xfb   :  { %v2354_v10 = vld [vmem:[#allocation8 + $0x50] sm:$0xf]  ;;  %v3187_v16 = vor.u32 %v3558_v8, %v3186_v7  ;;  %v3028_v5 = vld [vmem:[#allocation8 + $0x5b0] sm:$0xf0] }
  0xfc   :  { %2036 = vmatpush.bf16.msrb.mxu2 %v3027_v38  ;;  %v3350_v11 = vld [vmem:[#allocation8 + $0x6c] sm:$0xf0]  ;;  %v3578_v7 = vld [vmem:[#allocation8 + $0x794] sm:$0xf] }
  0xfd   :  { %2050 = vmatpush.bf16.msrb.mxu3 %v3283_v41  ;;  %2010 = vmatpush.bf16.msrb.mxu0 %v2451_v44  ;;  %v2610_v13 = vld [vmem:[#allocation8 + $0x250] sm:$0xf]  ;;  %v2355_v19 = vor.u32 %v3350_v11, %v2354_v10  ;;  %v3386_v41 = vld [vmem:[#allocation8 + $0x194] sm:$0xf] }
  0xfe   :  { %2024 = vmatpush.bf16.msrb.mxu1 %v2707_v47  ;;  %v3414_v14 = vld [vmem:[#allocation8 + $0x26c] sm:$0xf0]  ;;  %v2516_v44 = vld [vmem:[#allocation8 + $0x1b0] sm:$0xf0] }
  0xff   :  { %v2898_v17 = vld [vmem:[#allocation8 + $0x490] sm:$0xf]  ;;  %v2611_v24 = vor.u32 %v3414_v14, %v2610_v13  ;;  %v2519_v55 = vor.u32 %v3386_v41, %v2516_v44  ;;  %v3284_v8 = vld [vmem:[#allocation8 + $0x7b0] sm:$0xf0] }
 0x100   :  { %2037 = vmatpush.bf16.msrb.mxu2 %v2995_v50  ;;  %v3486_v18 = vld [vmem:[#allocation8 + $0x4ac] sm:$0xf0]  ;;  %v3370_v10 = vld [vmem:[#allocation8 + $0x114] sm:$0xf] }
 0x101   :  { %2051 = vmatpush.bf16.msrb.mxu3 %v3251_v54  ;;  %2011 = vmatpush.bf16.msrb.mxu0 %v2419_v58  ;;  %v3154_v20 = vld [vmem:[#allocation8 + $0x690] sm:$0xf]  ;;  %v2899_v28 = vor.u32 %v3486_v18, %v2898_v17  ;;  %v3060_v54 = vld [vmem:[#allocation8 + $0x5f0] sm:$0xf0] }
 0x102   :  { %2025 = vmatpush.bf16.msrb.mxu1 %v2675_v61  ;;  %v3550_v22 = vld [vmem:[#allocation8 + $0x6ac] sm:$0xf0]  ;;  %v3316_v58 = vld [vmem:[#allocation8 + $0x7f0] sm:$0xf0] }
 0x103   :  { %v2322_v23 = vld [vmem:[#allocation8 + $0x10] sm:$0xf]  ;;  %v3155_v32 = vor.u32 %v3550_v22, %v3154_v20  ;;  %v3378_v61 = vld [vmem:[#allocation8 + $0x154] sm:$0xf] }
 0x104   :  { %2038 = vmatpush.bf16.msrb.mxu2 %v2963_v0  ;;  %v3342_v25 = vld [vmem:[#allocation8 + $0x2c] sm:$0xf0]  ;;  %v3063_v0 = vor.u32 %v3522_v53, %v3060_v54  ;;  %v2452_v11 = vld [vmem:[#allocation8 + $0x130] sm:$0xf0]  ;;  %v3191_v54 = vor.u32 %v3554_v45, %v3188_v46  ;;  %v3290_v45 = vld [vmem:[#allocation8 + $0x798] sm:$0xf] }
 0x105   :  { %2052 = vmatpush.bf16.msrb.mxu3 %v3219_v3  ;;  %2012 = vmatpush.bf16.msrb.mxu0 %v2387_v6  ;;  %v2578_v26 = vld [vmem:[#allocation8 + $0x210] sm:$0xf]  ;;  %v2323_v36 = vor.u32 %v3342_v25, %v2322_v23  ;;  %v3319_v3 = vor.u32 %v3586_v57, %v3316_v58  ;;  %v2487_v6 = vor.u32 %v3378_v61, %v2484_v62  ;;  %v3434_v13 = vld [vmem:[#allocation8 + $0x314] sm:$0xf]  ;;  %v3583_v46 = vld [vmem:[#allocation8 + $0x7b4] sm:$0xf0] }
 0x106   :  { %2026 = vmatpush.bf16.msrb.mxu1 %v2643_v9  ;;  %v3406_v27 = vld [vmem:[#allocation8 + $0x22c] sm:$0xf0]  ;;  %v2743_v9 = vor.u32 %v3442_v1, %v2740_v2  ;;  %v2708_v14 = vld [vmem:[#allocation8 + $0x330] sm:$0xf0] }
 0x107   :  { %v2866_v34 = vld [vmem:[#allocation8 + $0x450] sm:$0xf]  ;;  %v2579_v39 = vor.u32 %v3406_v27, %v2578_v26  ;;  %v3506_v17 = vld [vmem:[#allocation8 + $0x554] sm:$0xf]  ;;  %v2711_v23 = vor.u32 %v3434_v13, %v2708_v14 }
 0x108   :  { %2039 = vmatpush.bf16.msrb.mxu2 %v2931_v12  ;;  %v3478_v35 = vld [vmem:[#allocation8 + $0x46c] sm:$0xf0]  ;;  %v3031_v12 = vor.u32 %v3514_v4, %v3028_v5  ;;  %v2996_v18 = vld [vmem:[#allocation8 + $0x570] sm:$0xf0]  ;;  %v3399_v4 = vld [vmem:[#allocation8 + $0x1f4] sm:$0xf0] }
 0x109   :  { %2053 = vmatpush.bf16.msrb.mxu3 %v3187_v16  ;;  %2013 = vmatpush.bf16.msrb.mxu0 %v2355_v19  ;;  %v3122_v37 = vld [vmem:[#allocation8 + $0x650] sm:$0xf]  ;;  %v2867_v43 = vor.u32 %v3478_v35, %v2866_v34  ;;  %v3287_v16 = vor.u32 %v3578_v7, %v3284_v8  ;;  %v2455_v19 = vor.u32 %v3370_v10, %v2452_v11  ;;  %v3570_v20 = vld [vmem:[#allocation8 + $0x754] sm:$0xf]  ;;  %v2810_v5 = vld [vmem:[#allocation8 + $0x3d8] sm:$0xf] }
 0x10a   :  { %v3542_v38 = vld [vmem:[#allocation8 + $0x66c] sm:$0xf0]  ;;  %2027 = vmatpush.bf16.msrb.mxu1 %v2611_v24  ;;  %v3252_v22 = vld [vmem:[#allocation8 + $0x770] sm:$0xf0]  ;;  %v2999_v26 = vor.u32 %v3506_v17, %v2996_v18  ;;  %v3463_v7 = vld [vmem:[#allocation8 + $0x3f4] sm:$0xf0] }
 0x10b   :  { %v3123_v47 = vor.u32 %v3542_v38, %v3122_v37  ;;  %v2834_v48 = vld [vmem:[#allocation8 + $0x410] sm:$0xf]  ;;  %v3362_v24 = vld [vmem:[#allocation8 + $0xd4] sm:$0xf]  ;;  %v3255_v29 = vor.u32 %v3570_v20, %v3252_v22  ;;  %v2811_v17 = vor.u32 %v3463_v7, %v2810_v5  ;;  %v2778_v20 = vld [vmem:[#allocation8 + $0x398] sm:$0xf] }
 0x10c   :  { %2040 = vmatpush.bf16.msrb.mxu2 %v2899_v28  ;;  %v3470_v49 = vld [vmem:[#allocation8 + $0x42c] sm:$0xf0]  ;;  %v2420_v25 = vld [vmem:[#allocation8 + $0xf0] sm:$0xf0]  ;;  %v3455_v22 = vld [vmem:[#allocation8 + $0x3b4] sm:$0xf0] }
 0x10d   :  { %2054 = vmatpush.bf16.msrb.mxu3 %v3155_v32  ;;  %v3090_v50 = vld [vmem:[#allocation8 + $0x610] sm:$0xf]  ;;  %2014 = vmatpush.bf16.msrb.mxu0 %v2323_v36  ;;  %v2835_v60 = vor.u32 %v3470_v49, %v2834_v48  ;;  %v3426_v27 = vld [vmem:[#allocation8 + $0x2d4] sm:$0xf]  ;;  %v2423_v32 = vor.u32 %v3362_v24, %v2420_v25  ;;  %v3431_v5 = vld [vmem:[#allocation8 + $0x2f4] sm:$0xf0] }
 0x10e   :  { %v3534_v52 = vld [vmem:[#allocation8 + $0x62c] sm:$0xf0]  ;;  %2028 = vmatpush.bf16.msrb.mxu1 %v2579_v39  ;;  %v2676_v28 = vld [vmem:[#allocation8 + $0x2f0] sm:$0xf0] }
 0x10f   :  { %v3091_v63 = vor.u32 %v3534_v52, %v3090_v50  ;;  %v3498_v30 = vld [vmem:[#allocation8 + $0x514] sm:$0xf]  ;;  %v2679_v35 = vor.u32 %v3426_v27, %v2676_v28  ;;  %v3066_v28 = vld [vmem:[#allocation8 + $0x5d8] sm:$0xf] }
 0x110   :  { %2041 = vmatpush.bf16.msrb.mxu2 %v2867_v43  ;;  %2015 = vmatmul.bf16.vlgmr.msrb.gmra.mxu0 %v3821_v51  ;;  %v3220_v34 = vld [vmem:[#allocation8 + $0x730] sm:$0xf0]  ;;  %v2967_v38 = vor.u32 %v3498_v30, %v2964_v31  ;;  %v3322_v31 = vld [vmem:[#allocation8 + $0x7d8] sm:$0xf] }
 0x111   :  { %2063 = vmatpush.bf16.msra.mxu0 %v2551_v40  ;;  %2055 = vmatpush.bf16.msrb.mxu3 %v3123_v47  ;;  %v3354_v36 = vld [vmem:[#allocation8 + $0x94] sm:$0xf]  ;;  %v3223_v41 = vor.u32 %v3562_v33, %v3220_v34  ;;  %v2779_v33 = vor.u32 %v3455_v22, %v2778_v20 }
 0x112   :  { %2077 = vmatpush.bf16.msra.mxu1 %v2807_v42  ;;  %v2388_v37 = vld [vmem:[#allocation8 + $0xb0] sm:$0xf0] }
 0x113   :  { %2029 = vmatmul.bf16.vlgmr.msrb.gmra.mxu1 %v3823_v56  ;;  %v3418_v39 = vld [vmem:[#allocation8 + $0x294] sm:$0xf]  ;;  %v2391_v44 = vor.u32 %v3354_v36, %v2388_v37  ;;  %v3383_v36 = vld [vmem:[#allocation8 + $0x174] sm:$0xf0] }
 0x114   :  { %2042 = vmatpush.bf16.msrb.mxu2 %v2835_v60  ;;  %v2644_v40 = vld [vmem:[#allocation8 + $0x2b0] sm:$0xf0] }
 0x115   :  { %2064 = vmatpush.bf16.msra.mxu0 %v2519_v55  ;;  %2056 = vmatpush.bf16.msrb.mxu3 %v3091_v63  ;;  %v3490_v42 = vld [vmem:[#allocation8 + $0x4d4] sm:$0xf]  ;;  %v2647_v47 = vor.u32 %v3418_v39, %v2644_v40  ;;  %v2746_v39 = vld [vmem:[#allocation8 + $0x358] sm:$0xf] }
 0x116   :  { %2078 = vmatpush.bf16.msra.mxu1 %v2775_v59  ;;  %v2932_v43 = vld [vmem:[#allocation8 + $0x4f0] sm:$0xf0]  ;;  %v3447_v40 = vld [vmem:[#allocation8 + $0x374] sm:$0xf0] }
 0x117   :  { %2043 = vmatmul.bf16.vlgmr.msrb.gmra.mxu2 %v3827_v15  ;;  %v3346_v48 = vld [vmem:[#allocation8 + $0x54] sm:$0xf]  ;;  %v2935_v50 = vor.u32 %v3490_v42, %v2932_v43  ;;  %v3034_v42 = vld [vmem:[#allocation8 + $0x598] sm:$0xf] }
 0x118   :  { %2091 = vmatpush.bf16.msra.mxu2 %v3063_v0  ;;  %2057 = vmatmul.bf16.vlgmr.msrb.gmra.mxu3 %v3829_v21  ;;  %v2356_v49 = vld [vmem:[#allocation8 + $0x70] sm:$0xf0]  ;;  %v3519_v43 = vld [vmem:[#allocation8 + $0x5b4] sm:$0xf0] }
 0x119   :  { %2105 = vmatpush.bf16.msra.mxu3 %v3319_v3  ;;  %2065 = vmatpush.bf16.msra.mxu0 %v2487_v6  ;;  %v3410_v52 = vld [vmem:[#allocation8 + $0x254] sm:$0xf]  ;;  %v2359_v58 = vor.u32 %v3346_v48, %v2356_v49  ;;  %v2554_v3 = vld [vmem:[#allocation8 + $0x1d8] sm:$0xf] }
 0x11a   :  { %2079 = vmatpush.bf16.msra.mxu1 %v2743_v9  ;;  %v2612_v53 = vld [vmem:[#allocation8 + $0x270] sm:$0xf0]  ;;  %v2555_v14 = vor.u32 %v3399_v4, %v2554_v3  ;;  %v2458_v48 = vld [vmem:[#allocation8 + $0x118] sm:$0xf] }
 0x11b   :  { %v3482_v55 = vld [vmem:[#allocation8 + $0x494] sm:$0xf]  ;;  %v2615_v62 = vor.u32 %v3410_v52, %v2612_v53  ;;  %v3375_v49 = vld [vmem:[#allocation8 + $0x134] sm:$0xf0] }
 0x11c   :  { %2092 = vmatpush.bf16.msra.mxu2 %v3031_v12  ;;  %v2900_v57 = vld [vmem:[#allocation8 + $0x4b0] sm:$0xf0]  ;;  %v2714_v52 = vld [vmem:[#allocation8 + $0x318] sm:$0xf] }
 0x11d   :  { %2106 = vmatpush.bf16.msra.mxu3 %v3287_v16  ;;  %2066 = vmatpush.bf16.msra.mxu0 %v2455_v19  ;;  %v3546_v59 = vld [vmem:[#allocation8 + $0x694] sm:$0xf]  ;;  %v2903_v2 = vor.u32 %v3482_v55, %v2900_v57  ;;  %v2522_v16 = vld [vmem:[#allocation8 + $0x198] sm:$0xf]  ;;  %v3291_v55 = vor.u32 %v3583_v46, %v3290_v45 }
 0x11e   :  { %2080 = vmatpush.bf16.msra.mxu1 %v2711_v23  ;;  %v3156_v60 = vld [vmem:[#allocation8 + $0x6b0] sm:$0xf0]  ;;  %v3391_v19 = vld [vmem:[#allocation8 + $0x1b4] sm:$0xf0] }
 0x11f   :  { %v3338_v61 = vld [vmem:[#allocation8 + $0x14] sm:$0xf]  ;;  %v3159_v6 = vor.u32 %v3546_v59, %v3156_v60  ;;  %v2523_v30 = vor.u32 %v3391_v19, %v2522_v16  ;;  %v3439_v53 = vld [vmem:[#allocation8 + $0x334] sm:$0xf0]  ;;  %v3852_v59 = vld [vmem:[#allocation10] sm:$0xff]  ;;  %v2459_v60 = vor.u32 %v3375_v49, %v2458_v48 }
 0x120   :  { %2093 = vmatpush.bf16.msra.mxu2 %v2999_v26  ;;  %v2324_v63 = vld [vmem:[#allocation8 + $0x30] sm:$0xf0]  ;;  %v3002_v57 = vld [vmem:[#allocation8 + $0x558] sm:$0xf] }
 0x121   :  { %2107 = vmatpush.bf16.msra.mxu3 %v3255_v29  ;;  %2067 = vmatpush.bf16.msra.mxu0 %v2423_v32  ;;  %v3402_v0 = vld [vmem:[#allocation8 + $0x214] sm:$0xf]  ;;  %v2327_v10 = vor.u32 %v3338_v61, %v2324_v63  ;;  %v3527_v29 = vld [vmem:[#allocation8 + $0x5f4] sm:$0xf0] }
 0x122   :  { %2081 = vmatpush.bf16.msra.mxu1 %v2679_v35  ;;  %v2580_v1 = vld [vmem:[#allocation8 + $0x230] sm:$0xf0]  ;;  %v3591_v32 = vld [vmem:[#allocation8 + $0x7f4] sm:$0xf0] }
 0x123   :  { %v3474_v8 = vld [vmem:[#allocation8 + $0x454] sm:$0xf]  ;;  %v2583_v13 = vor.u32 %v3402_v0, %v2580_v1  ;;  %v2490_v35 = vld [vmem:[#allocation8 + $0x158] sm:$0xf]  ;;  %v2715_v0 = vor.u32 %v3439_v53, %v2714_v52  ;;  %v3395_v53 = vld [vmem:[#allocation8 + $0x1dc] sm:$0xf] }
 0x124   :  { %2094 = vmatpush.bf16.msra.mxu2 %v2967_v38  ;;  %v2868_v9 = vld [vmem:[#allocation8 + $0x470] sm:$0xf0]  ;;  %v3067_v38 = vor.u32 %v3527_v29, %v3066_v28  ;;  %v3258_v61 = vld [vmem:[#allocation8 + $0x758] sm:$0xf] }
 0x125   :  { %2108 = vmatpush.bf16.msra.mxu3 %v3223_v41  ;;  %2068 = vmatpush.bf16.msra.mxu0 %v2391_v44  ;;  %v3538_v11 = vld [vmem:[#allocation8 + $0x654] sm:$0xf]  ;;  %v2871_v18 = vor.u32 %v3474_v8, %v2868_v9  ;;  %v3323_v41 = vor.u32 %v3591_v32, %v3322_v31  ;;  %v2491_v44 = vor.u32 %v3383_v36, %v2490_v35  ;;  %v2426_v1 = vld [vmem:[#allocation8 + $0xd8] sm:$0xf] }
 0x126   :  { %2082 = vmatpush.bf16.msra.mxu1 %v2647_v47  ;;  %v3124_v12 = vld [vmem:[#allocation8 + $0x670] sm:$0xf0]  ;;  %v2747_v47 = vor.u32 %v3447_v40, %v2746_v39  ;;  %v2682_v4 = vld [vmem:[#allocation8 + $0x2d8] sm:$0xf] }
 0x127   :  { %v3127_v23 = vor.u32 %v3538_v11, %v3124_v12  ;;  %v3466_v24 = vld [vmem:[#allocation8 + $0x414] sm:$0xf]  ;;  %v2970_v8 = vld [vmem:[#allocation8 + $0x518] sm:$0xf] }
 0x128   :  { %2095 = vmatpush.bf16.msra.mxu2 %v2935_v50  ;;  %v2836_v25 = vld [vmem:[#allocation8 + $0x430] sm:$0xf0]  ;;  %v3035_v50 = vor.u32 %v3519_v43, %v3034_v42  ;;  %v3503_v9 = vld [vmem:[#allocation8 + $0x534] sm:$0xf0] }
 0x129   :  { %2109 = vmatpush.bf16.msra.mxu3 %v3191_v54  ;;  %2069 = vmatpush.bf16.msra.mxu0 %v2359_v58  ;;  %v3530_v26 = vld [vmem:[#allocation8 + $0x614] sm:$0xf]  ;;  %v2839_v34 = vor.u32 %v3466_v24, %v2836_v25  ;;  %v3511_v58 = vld [vmem:[#allocation8 + $0x574] sm:$0xf0] }
 0x12a   :  { %2083 = vmatpush.bf16.msra.mxu1 %v2615_v62  ;;  %v3092_v27 = vld [vmem:[#allocation8 + $0x630] sm:$0xf0]  ;;  %v3575_v62 = vld [vmem:[#allocation8 + $0x774] sm:$0xf0]  ;;  %v3003_v3 = vor.u32 %v3511_v58, %v3002_v57 }
 0x12b   :  { %v3095_v37 = vor.u32 %v3530_v26, %v3092_v27  ;;  %v3259_v7 = vor.u32 %v3575_v62, %v3258_v61  ;;  %v3226_v11 = vld [vmem:[#allocation8 + $0x718] sm:$0xf]  ;;  %v2812_v62 = vld [vmem:[#allocation8 + $0x3f8] sm:$0xf0] }
 0x12c   :  { %2096 = vmatpush.bf16.msra.mxu2 %v2903_v2  ;;  %v1792_v54 = vpop.f32.mrf.mxu0  ;;  %v3367_v2 = vld [vmem:[#allocation8 + $0xf4] sm:$0xf0] }
 0x12d   :  { %2110 = vmatpush.bf16.msra.mxu3 %v3159_v6  ;;  %2070 = vmatpush.bf16.msra.mxu0 %v2327_v10  ;;  %v1806_v63 = vpop.f32.mrf.mxu1  ;;  %v487_v6 = vperm.slane %v3852_v59, 0  ;;  %v2427_v10 = vor.u32 %v3367_v2, %v2426_v1  ;;  %v3567_v12 = vld [vmem:[#allocation8 + $0x734] sm:$0xf0] }
 0x12e   :  { %2084 = vmatpush.bf16.msra.mxu1 %v2583_v13  ;;  %v2683_v13 = vor.u32 %v3431_v5, %v2682_v4  ;;  %v3359_v16 = vld [vmem:[#allocation8 + $0xb4] sm:$0xf0]  ;;  %v488_v4 = vperm.slane %v3852_v59, 1 }
 0x12f   :  { %v3423_v19 = vld [vmem:[#allocation8 + $0x2b4] sm:$0xf0]  ;;  %v1793_v20 = vadd.f32 %v1792_v54, %v487_v6  ;;  %v2556_v54 = vld [vmem:[#allocation8 + $0x1f8] sm:$0xf0] }
 0x130   :  { %2097 = vmatpush.bf16.msra.mxu2 %v2871_v18  ;;  %2071 = vmatmul.bf16.vlgmr.msra.gmra.mxu0 %v3821_v51  ;;  %v2650_v18 = vld [vmem:[#allocation8 + $0x298] sm:$0xf] }
 0x131   :  { %2119 = vmatpush.bf16.msrb.mxu0 %v2555_v14  ;;  %2111 = vmatpush.bf16.msra.mxu3 %v3127_v23  ;;  %v2394_v14 = vld [vmem:[#allocation8 + $0x98] sm:$0xf]  ;;  %v3227_v23 = vor.u32 %v3567_v12, %v3226_v11  ;;  %v2651_v29 = vor.u32 %v3423_v19, %v2650_v18  ;;  %v1807_v35 = vadd.f32 %v1806_v63, %v1793_v20  ;;  %v3451_v11 = vld [vmem:[#allocation8 + $0x39c] sm:$0xf] }
 0x132   :  { %2133 = vmatpush.bf16.msrb.mxu1 %v2811_v17  ;;  %v2971_v17 = vor.u32 %v3503_v9, %v2970_v8  ;;  %v2938_v24 = vld [vmem:[#allocation8 + $0x4d8] sm:$0xf]  ;;  %v2395_v26 = vor.u32 %v3359_v16, %v2394_v14  ;;  %v3387_v8 = vld [vmem:[#allocation8 + $0x19c] sm:$0xf] }
 0x133   :  { %2085 = vmatmul.bf16.vlgmr.msra.gmra.mxu1 %v3823_v56  ;;  %v3495_v25 = vld [vmem:[#allocation8 + $0x4f4] sm:$0xf0]  ;;  %v2524_v9 = vld [vmem:[#allocation8 + $0x1b8] sm:$0xf0] }
 0x134   :  { %2098 = vmatpush.bf16.msra.mxu2 %v2839_v34  ;;  %v1794_v22 = vpop.f32.mrf.mxu0  ;;  %v3194_v27 = vld [vmem:[#allocation8 + $0x6d8] sm:$0xf]  ;;  %v2939_v32 = vor.u32 %v3495_v25, %v2938_v24  ;;  %v2780_v12 = vld [vmem:[#allocation8 + $0x3b8] sm:$0xf0] }
 0x135   :  { %2120 = vmatpush.bf16.msrb.mxu0 %v2523_v30  ;;  %2112 = vmatpush.bf16.msra.mxu3 %v3095_v37  ;;  %v3559_v28 = vld [vmem:[#allocation8 + $0x6f4] sm:$0xf0]  ;;  %v1808_v36 = vpop.f32.mrf.mxu1  ;;  %v1795_v57 = vadd.f32 %v1794_v22, %v487_v6  ;;  %v3523_v22 = vld [vmem:[#allocation8 + $0x5dc] sm:$0xf] }
 0x136   :  { %2134 = vmatpush.bf16.msrb.mxu1 %v2779_v33  ;;  %v2362_v30 = vld [vmem:[#allocation8 + $0x58] sm:$0xf]  ;;  %v3195_v37 = vor.u32 %v3559_v28, %v3194_v27  ;;  %v2527_v27 = vor.u32 %v3387_v8, %v2524_v9  ;;  %v3587_v28 = vld [vmem:[#allocation8 + $0x7dc] sm:$0xf] }
 0x137   :  { %2099 = vmatmul.bf16.vlgmr.msra.gmra.mxu2 %v3827_v15  ;;  %v3351_v31 = vld [vmem:[#allocation8 + $0x74] sm:$0xf0]  ;;  %v1809_v14 = vadd.f32 %v1808_v36, %v1795_v57 }
 0x138   :  { %2147 = vmatpush.bf16.msrb.mxu2 %v3067_v38  ;;  %2113 = vmatmul.bf16.vlgmr.msra.gmra.mxu3 %v3829_v21  ;;  %v2618_v33 = vld [vmem:[#allocation8 + $0x258] sm:$0xf] }
 0x139   :  { %2161 = vmatpush.bf16.msrb.mxu3 %v3323_v41  ;;  %2121 = vmatpush.bf16.msrb.mxu0 %v2491_v44  ;;  %v3415_v34 = vld [vmem:[#allocation8 + $0x274] sm:$0xf0]  ;;  %v2363_v41 = vor.u32 %v3351_v31, %v2362_v30  ;;  %v2783_v30 = vor.u32 %v3451_v11, %v2780_v12  ;;  %v2684_v11 = vld [vmem:[#allocation8 + $0x2f8] sm:$0xf0] }
 0x13a   :  { %2135 = vmatpush.bf16.msrb.mxu1 %v2747_v47  ;;  %v2906_v38 = vld [vmem:[#allocation8 + $0x498] sm:$0xf]  ;;  %v1820_v40 = vpop.f32.mrf.mxu2  ;;  %v2619_v47 = vor.u32 %v3415_v34, %v2618_v33  ;;  %v3379_v33 = vld [vmem:[#allocation8 + $0x15c] sm:$0xf] }
 0x13b   :  { %v3487_v39 = vld [vmem:[#allocation8 + $0x4b4] sm:$0xf0]  ;;  %v1821_v45 = vadd.f32 %v1820_v40, %v1807_v35  ;;  %v1834_v46 = vpop.f32.mrf.mxu3  ;;  %v2492_v34 = vld [vmem:[#allocation8 + $0x178] sm:$0xf0] }
 0x13c   :  { %2148 = vmatpush.bf16.msrb.mxu2 %v3035_v50  ;;  %v3162_v42 = vld [vmem:[#allocation8 + $0x698] sm:$0xf]  ;;  %v2907_v52 = vor.u32 %v3487_v39, %v2906_v38  ;;  %v3443_v38 = vld [vmem:[#allocation8 + $0x35c] sm:$0xf] }
 0x13d   :  { %2162 = vmatpush.bf16.msrb.mxu3 %v3291_v55  ;;  %2122 = vmatpush.bf16.msrb.mxu0 %v2459_v60  ;;  %v3551_v43 = vld [vmem:[#allocation8 + $0x6b4] sm:$0xf0]  ;;  %v3459_v55 = vld [vmem:[#allocation8 + $0x3dc] sm:$0xf]  ;;  %v1835_v58 = vadd.f32 %v1834_v46, %v1821_v45  ;;  %v1848_v60 = vpop.f32.mrf.mxu0  ;;  %v1862_v24 = vpop.f32.mrf.mxu1 }
 0x13e   :  { %2136 = vmatpush.bf16.msrb.mxu1 %v2715_v0  ;;  %v2330_v44 = vld [vmem:[#allocation8 + $0x18] sm:$0xf]  ;;  %v3163_v61 = vor.u32 %v3551_v43, %v3162_v42  ;;  %v2815_v6 = vor.u32 %v3459_v55, %v2812_v62  ;;  %v1849_v35 = vadd.f32 %v1848_v60, %v488_v4  ;;  %v2748_v39 = vld [vmem:[#allocation8 + $0x378] sm:$0xf0] }
 0x13f   :  { %v3343_v48 = vld [vmem:[#allocation8 + $0x34] sm:$0xf0]  ;;  %2231 = vst [vmem:[#allocation11] sm:$0xff] %v1835_v58  ;;  %v3515_v42 = vld [vmem:[#allocation8 + $0x59c] sm:$0xf] }
 0x140   :  { %2149 = vmatpush.bf16.msrb.mxu2 %v3003_v3  ;;  %v2586_v49 = vld [vmem:[#allocation8 + $0x218] sm:$0xf]  ;;  %v2331_v1 = vor.u32 %v3343_v48, %v2330_v44  ;;  %v3036_v43 = vld [vmem:[#allocation8 + $0x5b8] sm:$0xf0]  ;;  %v2495_v44 = vor.u32 %v3379_v33, %v2492_v34 }
 0x141   :  { %2163 = vmatpush.bf16.msrb.mxu3 %v3259_v7  ;;  %2123 = vmatpush.bf16.msrb.mxu0 %v2427_v10  ;;  %v3407_v50 = vld [vmem:[#allocation8 + $0x234] sm:$0xf0]  ;;  %v2559_v7 = vor.u32 %v3395_v53, %v2556_v54  ;;  %v3579_v45 = vld [vmem:[#allocation8 + $0x79c] sm:$0xf] }
 0x142   :  { %2137 = vmatpush.bf16.msrb.mxu1 %v2683_v13  ;;  %v2874_v63 = vld [vmem:[#allocation8 + $0x458] sm:$0xf]  ;;  %v2587_v5 = vor.u32 %v3407_v50, %v2586_v49  ;;  %v1822_v20 = vpop.f32.mrf.mxu2  ;;  %v3292_v46 = vld [vmem:[#allocation8 + $0x7b8] sm:$0xf0]  ;;  %v1863_v50 = vadd.f32 %v1862_v24, %v1849_v35 }
 0x143   :  { %v3479_v0 = vld [vmem:[#allocation8 + $0x474] sm:$0xf0]  ;;  %v1823_v25 = vadd.f32 %v1822_v20, %v1809_v14  ;;  %v3371_v48 = vld [vmem:[#allocation8 + $0x11c] sm:$0xf]  ;;  %v3295_v57 = vor.u32 %v3579_v45, %v3292_v46 }
 0x144   :  { %2150 = vmatpush.bf16.msrb.mxu2 %v2971_v17  ;;  %v3130_v2 = vld [vmem:[#allocation8 + $0x658] sm:$0xf]  ;;  %v2875_v10 = vor.u32 %v3479_v0, %v2874_v63  ;;  %v2460_v49 = vld [vmem:[#allocation8 + $0x138] sm:$0xf0] }
 0x145   :  { %2164 = vmatpush.bf16.msrb.mxu3 %v3227_v23  ;;  %2124 = vmatpush.bf16.msrb.mxu0 %v2395_v26  ;;  %v3543_v3 = vld [vmem:[#allocation8 + $0x674] sm:$0xf0]  ;;  %v3068_v23 = vld [vmem:[#allocation8 + $0x5f8] sm:$0xf0]  ;;  %v1836_v26 = vpop.f32.mrf.mxu3  ;;  %v1850_v40 = vpop.f32.mrf.mxu0  ;;  %v2463_v63 = vor.u32 %v3371_v48, %v2460_v49 }
 0x146   :  { %2138 = vmatpush.bf16.msrb.mxu1 %v2651_v29  ;;  %v2842_v13 = vld [vmem:[#allocation8 + $0x418] sm:$0xf]  ;;  %v3131_v16 = vor.u32 %v3543_v3, %v3130_v2  ;;  %v3324_v29 = vld [vmem:[#allocation8 + $0x7f8] sm:$0xf0]  ;;  %v1837_v36 = vadd.f32 %v1836_v26, %v1823_v25  ;;  %v1864_v8 = vpop.f32.mrf.mxu1 }
 0x147   :  { %v3471_v17 = vld [vmem:[#allocation8 + $0x434] sm:$0xf0]  ;;  %v3435_v53 = vld [vmem:[#allocation8 + $0x31c] sm:$0xf] }
 0x148   :  { %2151 = vmatpush.bf16.msrb.mxu2 %v2939_v32  ;;  %v3098_v18 = vld [vmem:[#allocation8 + $0x618] sm:$0xf]  ;;  %v2843_v31 = vor.u32 %v3471_v17, %v2842_v13  ;;  %2239 = vst [vmem:[#allocation11 + $0x40] sm:$0xff] %v1837_v36  ;;  %v2716_v54 = vld [vmem:[#allocation8 + $0x338] sm:$0xf0] }
 0x149   :  { %2165 = vmatpush.bf16.msrb.mxu3 %v3195_v37  ;;  %2125 = vmatpush.bf16.msrb.mxu0 %v2363_v41  ;;  %v3535_v19 = vld [vmem:[#allocation8 + $0x634] sm:$0xf0]  ;;  %v3071_v37 = vor.u32 %v3523_v22, %v3068_v23  ;;  %v3327_v41 = vor.u32 %v3587_v28, %v3324_v29  ;;  %v3507_v58 = vld [vmem:[#allocation8 + $0x55c] sm:$0xf]  ;;  %v2719_v2 = vor.u32 %v3435_v53, %v2716_v54 }
 0x14a   :  { %2139 = vmatpush.bf16.msrb.mxu1 %v2619_v47  ;;  %v3099_v32 = vor.u32 %v3535_v19, %v3098_v18  ;;  %v2751_v47 = vor.u32 %v3443_v38, %v2748_v39  ;;  %v1876_v55 = vpop.f32.mrf.mxu2  ;;  %v3004_v60 = vld [vmem:[#allocation8 + $0x578] sm:$0xf0] }
 0x14b   :  { %v3571_v0 = vld [vmem:[#allocation8 + $0x75c] sm:$0xf] }
 0x14c   :  { %2152 = vmatpush.bf16.msrb.mxu2 %v2907_v52  ;;  %v3039_v52 = vor.u32 %v3515_v42, %v3036_v43  ;;  %v3363_v3 = vld [vmem:[#allocation8 + $0xdc] sm:$0xf] }
 0x14d   :  { %2166 = vmatpush.bf16.msrb.mxu3 %v3163_v61  ;;  %2126 = vmatpush.bf16.msrb.mxu0 %v2331_v1  ;;  %v1877_v61 = vadd.f32 %v1876_v55, %v1863_v50  ;;  %v1890_v62 = vpop.f32.mrf.mxu3  ;;  %v3260_v1 = vld [vmem:[#allocation8 + $0x778] sm:$0xf0]  ;;  %v1904_v19 = vpop.f32.mrf.mxu0 }
 0x14e   :  { %2140 = vmatpush.bf16.msrb.mxu1 %v2587_v5  ;;  %v2428_v5 = vld [vmem:[#allocation8 + $0xf8] sm:$0xf0]  ;;  %v3263_v12 = vor.u32 %v3571_v0, %v3260_v1 }
 0x14f   :  { %v1891_v9 = vadd.f32 %v1890_v62, %v1877_v61  ;;  %v3499_v13 = vld [vmem:[#allocation8 + $0x51c] sm:$0xf] }
 0x150   :  { %2153 = vmatpush.bf16.msrb.mxu2 %v2875_v10  ;;  %2127 = vmatmul.bf16.vlgmr.msrb.gmra.mxu0 %v3821_v51  ;;  %v3427_v10 = vld [vmem:[#allocation8 + $0x2dc] sm:$0xf]  ;;  %v1918_v48 = vpop.f32.mrf.mxu1 }
 0x151   :  { %2175 = vmatpush.bf16.msra.mxu0 %v2559_v7  ;;  %2167 = vmatpush.bf16.msrb.mxu3 %v3131_v16  ;;  %v1851_v7 = vadd.f32 %v1850_v40, %v488_v4  ;;  %v2972_v14 = vld [vmem:[#allocation8 + $0x538] sm:$0xf0]  ;;  %2232 = vst [vmem:[#allocation11 + $0x8] sm:$0xff] %v1891_v9  ;;  %v2431_v16 = vor.u32 %v3363_v3, %v2428_v5 }
 0x152   :  { %2189 = vmatpush.bf16.msra.mxu1 %v2815_v6  ;;  %v3007_v6 = vor.u32 %v3507_v58, %v3004_v60  ;;  %v3563_v17 = vld [vmem:[#allocation8 + $0x71c] sm:$0xf]  ;;  %v2687_v20 = vor.u32 %v3427_v10, %v2684_v11  ;;  %v2975_v24 = vor.u32 %v3499_v13, %v2972_v14  ;;  %v1878_v28 = vpop.f32.mrf.mxu2 }
 0x153   :  { %2141 = vmatmul.bf16.vlgmr.msrb.gmra.mxu1 %v3823_v56  ;;  %v3228_v18 = vld [vmem:[#allocation8 + $0x738] sm:$0xf0]  ;;  %v1865_v23 = vadd.f32 %v1864_v8, %v1851_v7 }
 0x154   :  { %2154 = vmatpush.bf16.msrb.mxu2 %v2843_v31  ;;  %v3355_v22 = vld [vmem:[#allocation8 + $0x9c] sm:$0xf]  ;;  %v3231_v29 = vor.u32 %v3563_v17, %v3228_v18 }
 0x155   :  { %2176 = vmatpush.bf16.msra.mxu0 %v2527_v27  ;;  %2168 = vmatpush.bf16.msrb.mxu3 %v3099_v32  ;;  %v2396_v4 = vld [vmem:[#allocation8 + $0xb8] sm:$0xf0]  ;;  %v489_v27 = vperm.slane %v3852_v59, 2  ;;  %v1879_v32 = vadd.f32 %v1878_v28, %v1865_v23  ;;  %v1892_v33 = vpop.f32.mrf.mxu3  ;;  %v1906_v62 = vpop.f32.mrf.mxu0  ;;  %v490_v28 = vperm.slane %v3852_v59, 3 }
 0x156   :  { %2190 = vmatpush.bf16.msra.mxu1 %v2783_v30  ;;  %v3419_v25 = vld [vmem:[#allocation8 + $0x29c] sm:$0xf]  ;;  %v2399_v34 = vor.u32 %v3355_v22, %v2396_v4 }
 0x157   :  { %2155 = vmatmul.bf16.vlgmr.msrb.gmra.mxu2 %v3827_v15  ;;  %v2652_v26 = vld [vmem:[#allocation8 + $0x2b8] sm:$0xf0]  ;;  %v1893_v40 = vadd.f32 %v1892_v33, %v1879_v32  ;;  %v1907_v11 = vadd.f32 %v1906_v62, %v489_v27 }
 0x158   :  { %2203 = vmatpush.bf16.msra.mxu2 %v3071_v37  ;;  %2169 = vmatmul.bf16.vlgmr.msrb.gmra.mxu3 %v3829_v21  ;;  %v3491_v30 = vld [vmem:[#allocation8 + $0x4dc] sm:$0xf]  ;;  %v2655_v37 = vor.u32 %v3419_v25, %v2652_v26 }
 0x159   :  { %2217 = vmatpush.bf16.msra.mxu3 %v3327_v41  ;;  %2177 = vmatpush.bf16.msra.mxu0 %v2495_v44  ;;  %v2940_v31 = vld [vmem:[#allocation8 + $0x4f8] sm:$0xf0]  ;;  %v1905_v44 = vadd.f32 %v1904_v19, %v489_v27  ;;  %2240 = vst [vmem:[#allocation11 + $0x48] sm:$0xff] %v1893_v40  ;;  %v1920_v19 = vpop.f32.mrf.mxu1 }
 0x15a   :  { %2191 = vmatpush.bf16.msra.mxu1 %v2751_v47  ;;  %v3555_v35 = vld [vmem:[#allocation8 + $0x6dc] sm:$0xf]  ;;  %v2943_v41 = vor.u32 %v3491_v30, %v2940_v31  ;;  %v1921_v22 = vadd.f32 %v1920_v19, %v1907_v11 }
 0x15b   :  { %v3196_v36 = vld [vmem:[#allocation8 + $0x6f8] sm:$0xf0]  ;;  %v1919_v61 = vadd.f32 %v1918_v48, %v1905_v44 }
 0x15c   :  { %2204 = vmatpush.bf16.msra.mxu2 %v3039_v52  ;;  %v3347_v38 = vld [vmem:[#allocation8 + $0x5c] sm:$0xf]  ;;  %v3199_v45 = vor.u32 %v3555_v35, %v3196_v36 }
 0x15d   :  { %2218 = vmatpush.bf16.msra.mxu3 %v3295_v57  ;;  %2178 = vmatpush.bf16.msra.mxu0 %v2463_v63  ;;  %v2364_v39 = vld [vmem:[#allocation8 + $0x78] sm:$0xf0]  ;;  %v1946_v3 = vpop.f32.mrf.mxu3 }
 0x15e   :  { %2192 = vmatpush.bf16.msra.mxu1 %v2719_v2  ;;  %v3411_v42 = vld [vmem:[#allocation8 + $0x25c] sm:$0xf]  ;;  %v2367_v49 = vor.u32 %v3347_v38, %v2364_v39  ;;  %v1932_v2 = vpop.f32.mrf.mxu2 }
 0x15f   :  { %v2620_v43 = vld [vmem:[#allocation8 + $0x278] sm:$0xf0]  ;;  %v1933_v9 = vadd.f32 %v1932_v2, %v1919_v61  ;;  %v492_v61 = vperm.slane %v3852_v59, 5 }
 0x160   :  { %2205 = vmatpush.bf16.msra.mxu2 %v3007_v6  ;;  %v3483_v46 = vld [vmem:[#allocation8 + $0x49c] sm:$0xf]  ;;  %v2623_v53 = vor.u32 %v3411_v42, %v2620_v43 }
 0x161   :  { %2219 = vmatpush.bf16.msra.mxu3 %v3263_v12  ;;  %2179 = vmatpush.bf16.msra.mxu0 %v2431_v16  ;;  %v2908_v47 = vld [vmem:[#allocation8 + $0x4b8] sm:$0xf0]  ;;  %v1947_v12 = vadd.f32 %v1946_v3, %v1933_v9 }
 0x162   :  { %2193 = vmatpush.bf16.msra.mxu1 %v2687_v20  ;;  %v3547_v50 = vld [vmem:[#allocation8 + $0x69c] sm:$0xf]  ;;  %v2911_v57 = vor.u32 %v3483_v46, %v2908_v47 }
 0x163   :  { %v3164_v52 = vld [vmem:[#allocation8 + $0x6b8] sm:$0xf0]  ;;  %2233 = vst [vmem:[#allocation11 + $0x10] sm:$0xff] %v1947_v12 }
 0x164   :  { %2206 = vmatpush.bf16.msra.mxu2 %v2975_v24  ;;  %v3339_v54 = vld [vmem:[#allocation8 + $0x1c] sm:$0xf]  ;;  %v3167_v63 = vor.u32 %v3547_v50, %v3164_v52 }
 0x165   :  { %2220 = vmatpush.bf16.msra.mxu3 %v3231_v29  ;;  %2180 = vmatpush.bf16.msra.mxu0 %v2399_v34  ;;  %v2332_v55 = vld [vmem:[#allocation8 + $0x38] sm:$0xf0]  ;;  %v1948_v25 = vpop.f32.mrf.mxu3 }
 0x166   :  { %2194 = vmatpush.bf16.msra.mxu1 %v2655_v37  ;;  %v3403_v58 = vld [vmem:[#allocation8 + $0x21c] sm:$0xf]  ;;  %v2335_v5 = vor.u32 %v3339_v54, %v2332_v55  ;;  %v1934_v23 = vpop.f32.mrf.mxu2 }
 0x167   :  { %v2588_v60 = vld [vmem:[#allocation8 + $0x238] sm:$0xf0]  ;;  %v1935_v24 = vadd.f32 %v1934_v23, %v1921_v22 }
 0x168   :  { %2207 = vmatpush.bf16.msra.mxu2 %v2943_v41  ;;  %v3475_v0 = vld [vmem:[#allocation8 + $0x45c] sm:$0xf]  ;;  %v2591_v6 = vor.u32 %v3403_v58, %v2588_v60  ;;  %v491_v41 = vperm.slane %v3852_v59, 4 }
 0x169   :  { %2221 = vmatpush.bf16.msra.mxu3 %v3199_v45  ;;  %v2876_v1 = vld [vmem:[#allocation8 + $0x478] sm:$0xf0]  ;;  %2181 = vmatpush.bf16.msra.mxu0 %v2367_v49  ;;  %v1949_v26 = vadd.f32 %v1948_v25, %v1935_v24 }
 0x16a   :  { %v3539_v7 = vld [vmem:[#allocation8 + $0x65c] sm:$0xf]  ;;  %2195 = vmatpush.bf16.msra.mxu1 %v2623_v53  ;;  %v2879_v10 = vor.u32 %v3475_v0, %v2876_v1 }
 0x16b   :  { %v3132_v8 = vld [vmem:[#allocation8 + $0x678] sm:$0xf0]  ;;  %2241 = vst [vmem:[#allocation11 + $0x50] sm:$0xff] %v1949_v26 }
 0x16c   :  { %2208 = vmatpush.bf16.msra.mxu2 %v2911_v57  ;;  %v3135_v13 = vor.u32 %v3539_v7, %v3132_v8  ;;  %v3467_v14 = vld [vmem:[#allocation8 + $0x41c] sm:$0xf] }
 0x16d   :  { %2222 = vmatpush.bf16.msra.mxu3 %v3167_v63  ;;  %v2844_v16 = vld [vmem:[#allocation8 + $0x438] sm:$0xf0]  ;;  %2182 = vmatpush.bf16.msra.mxu0 %v2335_v5  ;;  %v1960_v27 = vpop.f32.mrf.mxu0 }
 0x16e   :  { %v3531_v17 = vld [vmem:[#allocation8 + $0x61c] sm:$0xf]  ;;  %2196 = vmatpush.bf16.msra.mxu1 %v2591_v6  ;;  %v2847_v20 = vor.u32 %v3467_v14, %v2844_v16  ;;  %v1961_v29 = vadd.f32 %v1960_v27, %v490_v28  ;;  %v493_v16 = vperm.slane %v3852_v59, 6 }
 0x16f   :  { %v3100_v18 = vld [vmem:[#allocation8 + $0x638] sm:$0xf0] }
 0x170   :  { %2209 = vmatpush.bf16.msra.mxu2 %v2879_v10  ;;  %2183 = vmatmul.bf16.vlgmr.msra.gmra.mxu0 %v3821_v51  ;;  %v3103_v4 = vor.u32 %v3531_v17, %v3100_v18  ;;  %v1974_v30 = vpop.f32.mrf.mxu1 }
 0x171   :  { %2223 = vmatpush.bf16.msra.mxu3 %v3135_v13  ;;  %2197 = vmatmul.bf16.vlgmr.msra.gmra.mxu1 %v3823_v56  ;;  %v1975_v51 = vadd.f32 %v1974_v30, %v1961_v29 }
 0x174   :  { %2210 = vmatpush.bf16.msra.mxu2 %v2847_v20 }
 0x175   :  { %2224 = vmatpush.bf16.msra.mxu3 %v3103_v4  ;;  %v1962_v31 = vpop.f32.mrf.mxu0 }
 0x176   :  { %v1963_v34 = vadd.f32 %v1962_v31, %v490_v28 }
 0x177   :  { %2211 = vmatmul.bf16.vlgmr.msra.gmra.mxu2 %v3827_v15 }
 0x178   :  { %2225 = vmatmul.bf16.vlgmr.msra.gmra.mxu3 %v3829_v21  ;;  %v1976_v36 = vpop.f32.mrf.mxu1 }
 0x179   :  { %v1977_v37 = vadd.f32 %v1976_v36, %v1963_v34 }
 0x17a   :  { %v1988_v32 = vpop.f32.mrf.mxu2 }
 0x17b   :  { %v1989_v56 = vadd.f32 %v1988_v32, %v1975_v51  ;;  %v2002_v33 = vpop.f32.mrf.mxu3  ;;  %v494_v32 = vperm.slane %v3852_v59, 7 }
 0x17d   :  { %v2003_v35 = vadd.f32 %v2002_v33, %v1989_v56 }
 0x17f   :  { %2234 = vst [vmem:[#allocation11 + $0x18] sm:$0xff] %v2003_v35 }
 0x182   :  { %v1990_v38 = vpop.f32.mrf.mxu2 }
 0x183   :  { %v1991_v39 = vadd.f32 %v1990_v38, %v1977_v37  ;;  %v2004_v15 = vpop.f32.mrf.mxu3 }
 0x185   :  { %v2005_v40 = vadd.f32 %v2004_v15, %v1991_v39 }
 0x187   :  { %2242 = vst [vmem:[#allocation11 + $0x58] sm:$0xff] %v2005_v40 }
 0x18d   :  { %v2016_v21 = vpop.f32.mrf.mxu0 }
 0x18e   :  { %v2017_v42 = vadd.f32 %v2016_v21, %v491_v41 }
 0x190   :  { %v2030_v43 = vpop.f32.mrf.mxu1 }
 0x191   :  { %v2031_v44 = vadd.f32 %v2030_v43, %v2017_v42 }
 0x195   :  { %v2018_v45 = vpop.f32.mrf.mxu0 }
 0x196   :  { %v2019_v49 = vadd.f32 %v2018_v45, %v491_v41 }
 0x198   :  { %v2032_v52 = vpop.f32.mrf.mxu1 }
 0x199   :  { %v2033_v53 = vadd.f32 %v2032_v52, %v2019_v49 }
 0x19a   :  { %v2044_v46 = vpop.f32.mrf.mxu2 }
 0x19b   :  { %v2045_v47 = vadd.f32 %v2044_v46, %v2031_v44  ;;  %v2058_v48 = vpop.f32.mrf.mxu3 }
 0x19d   :  { %v2059_v50 = vadd.f32 %v2058_v48, %v2045_v47 }
 0x19f   :  { %2235 = vst [vmem:[#allocation11 + $0x20] sm:$0xff] %v2059_v50 }
 0x1a2   :  { %v2046_v54 = vpop.f32.mrf.mxu2 }
 0x1a3   :  { %v2047_v55 = vadd.f32 %v2046_v54, %v2033_v53  ;;  %v2060_v57 = vpop.f32.mrf.mxu3 }
 0x1a5   :  { %v2061_v58 = vadd.f32 %v2060_v57, %v2047_v55 }
 0x1a7   :  { %2243 = vst [vmem:[#allocation11 + $0x60] sm:$0xff] %v2061_v58 }
 0x1ad   :  { %v2072_v60 = vpop.f32.mrf.mxu0 }
 0x1ae   :  { %v2073_v62 = vadd.f32 %v2072_v60, %v492_v61 }
 0x1b0   :  { %v2086_v63 = vpop.f32.mrf.mxu1 }
 0x1b1   :  { %v2087_v0 = vadd.f32 %v2086_v63, %v2073_v62 }
 0x1b5   :  { %v2074_v1 = vpop.f32.mrf.mxu0 }
 0x1b6   :  { %v2075_v7 = vadd.f32 %v2074_v1, %v492_v61 }
 0x1b8   :  { %v2088_v9 = vpop.f32.mrf.mxu1 }
 0x1b9   :  { %v2089_v6 = vadd.f32 %v2088_v9, %v2075_v7 }
 0x1ba   :  { %v2100_v2 = vpop.f32.mrf.mxu2 }
 0x1bb   :  { %v2101_v3 = vadd.f32 %v2100_v2, %v2087_v0  ;;  %v2114_v5 = vpop.f32.mrf.mxu3 }
 0x1bd   :  { %v2115_v8 = vadd.f32 %v2114_v5, %v2101_v3 }
 0x1bf   :  { %2236 = vst [vmem:[#allocation11 + $0x28] sm:$0xff] %v2115_v8 }
 0x1c2   :  { %v2102_v10 = vpop.f32.mrf.mxu2 }
 0x1c3   :  { %v2103_v11 = vadd.f32 %v2102_v10, %v2089_v6  ;;  %v2116_v12 = vpop.f32.mrf.mxu3 }
 0x1c5   :  { %v2117_v13 = vadd.f32 %v2116_v12, %v2103_v11 }
 0x1c7   :  { %2244 = vst [vmem:[#allocation11 + $0x68] sm:$0xff] %v2117_v13 }
 0x1cd   :  { %v2128_v14 = vpop.f32.mrf.mxu0 }
 0x1ce   :  { %v2129_v17 = vadd.f32 %v2128_v14, %v493_v16 }
 0x1d0   :  { %v2142_v18 = vpop.f32.mrf.mxu1 }
 0x1d1   :  { %v2143_v19 = vadd.f32 %v2142_v18, %v2129_v17 }
 0x1d5   :  { %v2130_v20 = vpop.f32.mrf.mxu0 }
 0x1d6   :  { %v2131_v24 = vadd.f32 %v2130_v20, %v493_v16 }
 0x1d8   :  { %v2144_v26 = vpop.f32.mrf.mxu1 }
 0x1d9   :  { %v2145_v27 = vadd.f32 %v2144_v26, %v2131_v24 }
 0x1da   :  { %v2156_v22 = vpop.f32.mrf.mxu2 }
 0x1db   :  { %v2157_v4 = vadd.f32 %v2156_v22, %v2143_v19  ;;  %v2170_v23 = vpop.f32.mrf.mxu3 }
 0x1dd   :  { %v2171_v25 = vadd.f32 %v2170_v23, %v2157_v4 }
 0x1df   :  { %2237 = vst [vmem:[#allocation11 + $0x30] sm:$0xff] %v2171_v25 }
 0x1e2   :  { %v2158_v28 = vpop.f32.mrf.mxu2 }
 0x1e3   :  { %v2159_v29 = vadd.f32 %v2158_v28, %v2145_v27  ;;  %v2172_v30 = vpop.f32.mrf.mxu3 }
 0x1e5   :  { %v2173_v51 = vadd.f32 %v2172_v30, %v2159_v29 }
 0x1e7   :  { %2245 = vst [vmem:[#allocation11 + $0x70] sm:$0xff] %v2173_v51 }
 0x1ed   :  { %v2184_v31 = vpop.f32.mrf.mxu0 }
 0x1ee   :  { %v2185_v56 = vadd.f32 %v2184_v31, %v494_v32  ;;  %v2198_v33 = vpop.f32.mrf.mxu1 }
 0x1f0   :  { %v2199_v34 = vadd.f32 %v2198_v33, %v2185_v56 }
 0x1f5   :  { %v2186_v35 = vpop.f32.mrf.mxu0 }
 0x1f6   :  { %v2187_v39 = vadd.f32 %v2186_v35, %v494_v32  ;;  %v2200_v40 = vpop.f32.mrf.mxu1 }
 0x1f8   :  { %v2201_v21 = vadd.f32 %v2200_v40, %v2187_v39 }
 0x1fa   :  { %v2212_v36 = vpop.f32.mrf.mxu2 }
 0x1fb   :  { %v2213_v37 = vadd.f32 %v2212_v36, %v2199_v34  ;;  %v2226_v38 = vpop.f32.mrf.mxu3 }
 0x1fd   :  { %v2227_v15 = vadd.f32 %v2226_v38, %v2213_v37 }
 0x1ff   :  { %2238 = vst [vmem:[#allocation11 + $0x38] sm:$0xff] %v2227_v15 }
 0x202   :  { %v2214_v41 = vpop.f32.mrf.mxu2 }
 0x203   :  { %v2215_v42 = vadd.f32 %v2214_v41, %v2201_v21  ;;  %v2228_v43 = vpop.f32.mrf.mxu3 }
 0x205   :  { %v2229_v44 = vadd.f32 %v2228_v43, %v2215_v42 }
 0x207   :  { %2246 = vst [vmem:[#allocation11 + $0x78] sm:$0xff] %v2229_v44 }
 0x208   :  { %2250 = vsyncadd [#allocation4], 1024  ;;  %s2253_s21 = sshll.u32 %s3883_s5, 4  ;;  %s3769_s22 = smov [#allocation11]   ;;  %s2254_s21 = int_to_ptr.hbm [resolvable:$true] %s2253_s21 }
 0x209   :  { %s2251_s23 = sshll.u32 %s3769_s22, 4  ;;  %s3770_s24 = smov 1024   ;;  %s2252_s23 = int_to_ptr.vmem [resolvable:$true] %s2251_s23 }
 0x20a   :  { %s3771_s25 = smov 64  }
 0x20b   :  { %2259 = dma.vmem_to_hbm [thread:$0]  %s2252_s23, 1024, %s2254_s21, [#allocation4], %s3770_s24, %s3770_s24, %s3771_s25  }
 0x20c   :  { %3756 = dma.done.wait [#allocation4], 2048  }
 0x20d   :  { %3757 = vsyncadd [#allocation4], 4294965248 }
 0x20e   :  { %2264 = vsyncpa [#allocation3], 1 }
 0x20f   :  { %2265 = vsyncpa [#allocation6], 1 }
 0x210   :  { %2266 = vsyncpa [#allocation9], 1 }
 0x211   :  { %2267 = vsyncpa [#allocation4], 1 }

</bundles_post_ra>
